<compile_context>
chip_gen: v7x
topology: tpu7x:2x2x1
jax: 0.10.0
libtpu: 0.0.40
codegen_flags: <defaults>
</compile_context>

<pallas_src>
import jax
import jax.numpy as jnp
from jax.experimental import pallas as pl
from jax.experimental.pallas import tpu as pltpu

B = 2                      # batch
H = W = 28                 # spatial size implied by fc1 (32 * 14 * 14)
CIN = 1
COUT = 32
KH = KW = 3
KTAPS = KH * KW            # 9 conv taps
KPAD = 16                  # tap (reduction) dim zero-padded to a sublane multiple
PH = PW = H // 2           # 14
NPIX = PH * PW             # 196 pooled positions per channel
FEAT = COUT * NPIX         # 6272
NCLS = 10
NPHASE = 4                 # the 4 positions inside every 2x2 maxpool window


# ---------------------------------------------------------------- kernel -----
def _fused_cnn_kernel(xcol_ref, wc_ref, bc_ref, wfc_ref, bfc_ref, o_ref):
    """conv3x3(pad=1) + bias + ReLU + maxpool2x2 + fc1 for the whole batch, one step.

    xcol_ref : [B, 4, 16, 196] f32 VMEM  per-pool-phase im2col taps
               xcol[b, 2a+bb, 3di+dj, 14i+j] = xpad[b, 2i+a+di, 2j+bb+dj]  (rows 9..15 zero)
    wc_ref   : [32, 16]        f32 VMEM  conv1 weight, wc[c, 3di+dj] (cols 9..15 zero)
    bc_ref   : [32, 1]         f32 VMEM  conv1 bias (column)
    wfc_ref  : [10, 32, 196]   f32 VMEM  fc1 weight = w_fc.reshape(10, 32, 196)
    bfc_ref  : [1, 10]         f32 VMEM  fc1 bias (row)
    o_ref    : [B, 10]         f32 VMEM  logits (lane-dense, class dim last)
    """
    nb = o_ref.shape[0]
    wc = wc_ref[...]                                              # [32, 16], MXU lhs, resident
    bc = bc_ref[...]                                              # [32, 1]
    lane = jax.lax.broadcasted_iota(jnp.int32, (1, NCLS), 1)      # [1, 10] class-lane ids

    for b in range(nb):                                           # B=2: tiny static unroll
        # ---- conv on the MXU: one [32,16] @ [16,196] matmul per pool phase --------
        pooled = None
        for ph in range(NPHASE):
            conv_ph = jnp.dot(wc, xcol_ref[b, ph],
                              preferred_element_type=jnp.float32)          # [32, 196]
            pooled = conv_ph if pooled is None else jnp.maximum(pooled, conv_ph)
        # maxpool == max over the 4 phases (above); per-channel bias + ReLU commute.
        pooled = jnp.maximum(pooled + bc, 0.0)                             # [32, 196]

        # ---- fc1 on the VPU: 10 x (8-vreg fma + lane reduce + sublane reduce) -----
        logits = bfc_ref[...]                                              # [1, 10]
        for cls in range(NCLS):
            prod = pooled * wfc_ref[cls]                                   # [32, 196]
            part = jnp.sum(prod, axis=1, keepdims=True)                    # [32, 1]
            part = jnp.sum(part, axis=0, keepdims=True)                    # [1, 1]
            logits = logits + jnp.where(lane == cls, part, 0.0)            # place in class lane
        o_ref[pl.ds(b, 1), :] = logits


# --------------------------------------------------------------- wrappers ----
def prepare_params(w_conv, b_conv, w_fc, b_fc):
    """One-time repack of the PyTorch-layout parameters into kernel-friendly layouts."""
    wc = jnp.pad(w_conv.reshape(COUT, KTAPS).astype(jnp.float32),
                 ((0, 0), (0, KPAD - KTAPS)))                       # [32, 16]
    bc = b_conv.reshape(COUT, 1).astype(jnp.float32)                # [32, 1]
    # PyTorch x.view(B,-1) flatten order is f = c*196 + i*14 + j, so a plain reshape
    # gives the [class, channel, pooled-position] layout the kernel consumes.
    wfc = w_fc.reshape(NCLS, COUT, NPIX).astype(jnp.float32)        # [10, 32, 196]
    bfc = b_fc.reshape(1, NCLS).astype(jnp.float32)                 # [1, 10]
    return wc, bc, wfc, bfc


@jax.jit
def simple_cnn_forward(x, wc, bc, wfc, bfc):
    # x: [B, 1, 28, 28] (NCHW, like PyTorch)
    n = x.shape[0]
    # Tiny wrapper-side im2col (~56 KB at B=2; fuses into one XLA copy): the 9 conv taps,
    # regrouped by 2x2 maxpool phase, so the kernel only does aligned matmuls + phase max.
    xpad = jnp.pad(x[:, 0], ((0, 0), (1, 1), (1, 1)))                               # [B, 30, 30]
    taps = jnp.stack([xpad[:, di:di + H, dj:dj + W]
                      for di in range(KH) for dj in range(KW)], axis=1)             # [B, 9, 28, 28]
    xcol = (taps.reshape(n, KTAPS, PH, 2, PW, 2)
                .transpose(0, 3, 5, 1, 2, 4)                                        # [B, 2, 2, 9, 14, 14]
                .reshape(n, NPHASE, KTAPS, NPIX))                                   # [B, 4, 9, 196]
    xcol = jnp.pad(xcol, ((0, 0), (0, 0), (0, KPAD - KTAPS), (0, 0)))               # [B, 4, 16, 196]

    flops = 2 * n * (H * W * KTAPS * COUT + FEAT * NCLS)
    bytes_accessed = 4 * (xcol.size + wc.size + bc.size + wfc.size + bfc.size + n * NCLS)

    # Single step (no grid): whole batch + all weights resident in VMEM (<0.6 MB).
    # For large B, switch to grid=(num_chunks,) over batch chunks with "parallel"
    # dimension_semantics so v7x's two TensorCores split the batch.
    return pl.pallas_call(
        _fused_cnn_kernel,
        out_shape=jax.ShapeDtypeStruct((n, NCLS), jnp.float32),
        in_specs=[pl.BlockSpec(memory_space=pltpu.MemorySpace.VMEM) for _ in range(5)],
        out_specs=pl.BlockSpec(memory_space=pltpu.MemorySpace.VMEM),
        cost_estimate=pl.CostEstimate(flops=flops, transcendentals=0,
                                      bytes_accessed=bytes_accessed),
    )(xcol, wc, bc, wfc, bfc)


# ------------------------------------------------------------- reference -----
def reference_forward(x, w_conv, b_conv, w_fc, b_fc):
    out = jax.lax.conv_general_dilated(
        x, w_conv, window_strides=(1, 1), padding=((1, 1), (1, 1)),
        dimension_numbers=("NCHW", "OIHW", "NCHW"),
        precision=jax.lax.Precision.HIGHEST)
    out = jnp.maximum(out + b_conv[None, :, None, None], 0.0)
    out = out.reshape(x.shape[0], COUT, PH, 2, PW, 2).max(axis=(3, 5))
    out = out.reshape(x.shape[0], -1)
    return jnp.dot(out, w_fc.T, precision=jax.lax.Precision.HIGHEST) + b_fc


# ------------------------------------------------------------------ main -----
if __name__ == "__main__":
    key = jax.random.PRNGKey(0)
    k1, k2, k3, k4, k5 = jax.random.split(key, 5)

    # deterministic synthetic parameters (PyTorch shapes)
    w_conv = jax.random.normal(k1, (COUT, CIN, KH, KW), jnp.float32) * 0.1   # conv1.weight
    b_conv = jax.random.normal(k2, (COUT,), jnp.float32) * 0.1               # conv1.bias
    w_fc = jax.random.normal(k3, (NCLS, FEAT), jnp.float32) * 0.02           # fc1.weight
    b_fc = jax.random.normal(k4, (NCLS,), jnp.float32) * 0.02                # fc1.bias

    x = jax.random.normal(k5, (B, CIN, H, W), jnp.float32)

    params = prepare_params(w_conv, b_conv, w_fc, b_fc)   # one-time weight repack
    out = jax.block_until_ready(simple_cnn_forward(x, *params))
    assert out.shape == (B, NCLS), out.shape

    ref = reference_forward(x, w_conv, b_conv, w_fc, b_fc)
    max_err = float(jnp.max(jnp.abs(out - ref)))
    assert jnp.allclose(out, ref, atol=5e-3, rtol=5e-3), max_err
    print("KERNEL_OK")
</pallas_src>

<mosaic_0001>
module attributes {stable_mosaic.version = 11 : i64} {
  func.func @_fused_cnn_kernel(%arg0: memref<2x4x16x196xf32, #tpu.memory_space<vmem>>, %arg1: memref<32x16xf32, #tpu.memory_space<vmem>>, %arg2: memref<32x1xf32, #tpu.memory_space<vmem>>, %arg3: memref<10x32x196xf32, #tpu.memory_space<vmem>>, %arg4: memref<1x10xf32, #tpu.memory_space<vmem>>, %arg5: memref<2x10xf32, #tpu.memory_space<vmem>>) attributes {dimension_semantics = [], scalar_prefetch = 0 : i64, scratch_operands = 0 : i64, tpu.core_type = #tpu.core_type<tc>} {
    %c0 = arith.constant 0 : index
    %c0_0 = arith.constant 0 : index
    %0 = vector.load %arg1[%c0, %c0_0] : memref<32x16xf32, #tpu.memory_space<vmem>>, vector<32x16xf32>
    %c0_1 = arith.constant 0 : index
    %c0_2 = arith.constant 0 : index
    %1 = vector.load %arg2[%c0_1, %c0_2] : memref<32x1xf32, #tpu.memory_space<vmem>>, vector<32x1xf32>
    %2 = tpu.iota {dimensions = array<i32: 1>} : vector<1x10xi32>
    %c0_3 = arith.constant 0 : index
    %c0_4 = arith.constant 0 : index
    %c0_5 = arith.constant 0 : index
    %c0_6 = arith.constant 0 : index
    %3 = vector.load %arg0[%c0_3, %c0_4, %c0_5, %c0_6] : memref<2x4x16x196xf32, #tpu.memory_space<vmem>>, vector<1x1x16x196xf32>
    %4 = vector.shape_cast %3 : vector<1x1x16x196xf32> to vector<16x196xf32>
    %cst = arith.constant dense<0.000000e+00> : vector<32x196xf32>
    %5 = tpu.matmul %0, %4, %cst {dimension_numbers = #tpu.dot_dimension_numbers<[1], [0], [0], [1], [0, 0, 1, 1], [], []>} : vector<32x16xf32>, vector<16x196xf32>, vector<32x196xf32> -> vector<32x196xf32>
    %c0_7 = arith.constant 0 : index
    %c1 = arith.constant 1 : index
    %c0_8 = arith.constant 0 : index
    %c0_9 = arith.constant 0 : index
    %6 = vector.load %arg0[%c0_7, %c1, %c0_8, %c0_9] : memref<2x4x16x196xf32, #tpu.memory_space<vmem>>, vector<1x1x16x196xf32>
    %7 = vector.shape_cast %6 : vector<1x1x16x196xf32> to vector<16x196xf32>
    %cst_10 = arith.constant dense<0.000000e+00> : vector<32x196xf32>
    %8 = tpu.matmul %0, %7, %cst_10 {dimension_numbers = #tpu.dot_dimension_numbers<[1], [0], [0], [1], [0, 0, 1, 1], [], []>} : vector<32x16xf32>, vector<16x196xf32>, vector<32x196xf32> -> vector<32x196xf32>
    %9 = arith.maximumf %5, %8 : vector<32x196xf32>
    %c0_11 = arith.constant 0 : index
    %c2 = arith.constant 2 : index
    %c0_12 = arith.constant 0 : index
    %c0_13 = arith.constant 0 : index
    %10 = vector.load %arg0[%c0_11, %c2, %c0_12, %c0_13] : memref<2x4x16x196xf32, #tpu.memory_space<vmem>>, vector<1x1x16x196xf32>
    %11 = vector.shape_cast %10 : vector<1x1x16x196xf32> to vector<16x196xf32>
    %cst_14 = arith.constant dense<0.000000e+00> : vector<32x196xf32>
    %12 = tpu.matmul %0, %11, %cst_14 {dimension_numbers = #tpu.dot_dimension_numbers<[1], [0], [0], [1], [0, 0, 1, 1], [], []>} : vector<32x16xf32>, vector<16x196xf32>, vector<32x196xf32> -> vector<32x196xf32>
    %13 = arith.maximumf %9, %12 : vector<32x196xf32>
    %c0_15 = arith.constant 0 : index
    %c3 = arith.constant 3 : index
    %c0_16 = arith.constant 0 : index
    %c0_17 = arith.constant 0 : index
    %14 = vector.load %arg0[%c0_15, %c3, %c0_16, %c0_17] : memref<2x4x16x196xf32, #tpu.memory_space<vmem>>, vector<1x1x16x196xf32>
    %15 = vector.shape_cast %14 : vector<1x1x16x196xf32> to vector<16x196xf32>
    %cst_18 = arith.constant dense<0.000000e+00> : vector<32x196xf32>
    %16 = tpu.matmul %0, %15, %cst_18 {dimension_numbers = #tpu.dot_dimension_numbers<[1], [0], [0], [1], [0, 0, 1, 1], [], []>} : vector<32x16xf32>, vector<16x196xf32>, vector<32x196xf32> -> vector<32x196xf32>
    %17 = arith.maximumf %13, %16 : vector<32x196xf32>
    %18 = vector.broadcast %1 : vector<32x1xf32> to vector<32x196xf32>
    %19 = arith.addf %17, %18 : vector<32x196xf32>
    %cst_19 = arith.constant 0.000000e+00 : f32
    %20 = vector.broadcast %cst_19 : f32 to vector<32x196xf32>
    %21 = arith.maximumf %19, %20 : vector<32x196xf32>
    %c0_20 = arith.constant 0 : index
    %c0_21 = arith.constant 0 : index
    %22 = vector.load %arg4[%c0_20, %c0_21] : memref<1x10xf32, #tpu.memory_space<vmem>>, vector<1x10xf32>
    %c0_22 = arith.constant 0 : index
    %c0_23 = arith.constant 0 : index
    %c0_24 = arith.constant 0 : index
    %23 = vector.load %arg3[%c0_22, %c0_23, %c0_24] : memref<10x32x196xf32, #tpu.memory_space<vmem>>, vector<1x32x196xf32>
    %24 = vector.shape_cast %23 : vector<1x32x196xf32> to vector<32x196xf32>
    %25 = arith.mulf %21, %24 : vector<32x196xf32>
    %cst_25 = arith.constant dense<0.000000e+00> : vector<32xf32>
    %26 = vector.multi_reduction <add>, %25, %cst_25 [1] : vector<32x196xf32> to vector<32xf32>
    %27 = vector.shape_cast %26 : vector<32xf32> to vector<32x1xf32>
    %cst_26 = arith.constant dense<0.000000e+00> : vector<1xf32>
    %28 = vector.multi_reduction <add>, %27, %cst_26 [0] : vector<32x1xf32> to vector<1xf32>
    %29 = vector.shape_cast %28 : vector<1xf32> to vector<1x1xf32>
    %c0_i32 = arith.constant 0 : i32
    %30 = vector.broadcast %c0_i32 : i32 to vector<1x10xi32>
    %31 = arith.cmpi eq, %2, %30 : vector<1x10xi32>
    %cst_27 = arith.constant 0.000000e+00 : f32
    %32 = vector.shape_cast %29 : vector<1x1xf32> to vector<1x1xf32>
    %33 = vector.broadcast %32 : vector<1x1xf32> to vector<1x10xf32>
    %34 = vector.broadcast %cst_27 : f32 to vector<1x10xf32>
    %35 = arith.select %31, %33, %34 : vector<1x10xi1>, vector<1x10xf32>
    %36 = arith.addf %22, %35 : vector<1x10xf32>
    %c1_28 = arith.constant 1 : index
    %c0_29 = arith.constant 0 : index
    %c0_30 = arith.constant 0 : index
    %37 = vector.load %arg3[%c1_28, %c0_29, %c0_30] : memref<10x32x196xf32, #tpu.memory_space<vmem>>, vector<1x32x196xf32>
    %38 = vector.shape_cast %37 : vector<1x32x196xf32> to vector<32x196xf32>
    %39 = arith.mulf %21, %38 : vector<32x196xf32>
    %cst_31 = arith.constant dense<0.000000e+00> : vector<32xf32>
    %40 = vector.multi_reduction <add>, %39, %cst_31 [1] : vector<32x196xf32> to vector<32xf32>
    %41 = vector.shape_cast %40 : vector<32xf32> to vector<32x1xf32>
    %cst_32 = arith.constant dense<0.000000e+00> : vector<1xf32>
    %42 = vector.multi_reduction <add>, %41, %cst_32 [0] : vector<32x1xf32> to vector<1xf32>
    %43 = vector.shape_cast %42 : vector<1xf32> to vector<1x1xf32>
    %c1_i32 = arith.constant 1 : i32
    %44 = vector.broadcast %c1_i32 : i32 to vector<1x10xi32>
    %45 = arith.cmpi eq, %2, %44 : vector<1x10xi32>
    %cst_33 = arith.constant 0.000000e+00 : f32
    %46 = vector.shape_cast %43 : vector<1x1xf32> to vector<1x1xf32>
    %47 = vector.broadcast %46 : vector<1x1xf32> to vector<1x10xf32>
    %48 = vector.broadcast %cst_33 : f32 to vector<1x10xf32>
    %49 = arith.select %45, %47, %48 : vector<1x10xi1>, vector<1x10xf32>
    %50 = arith.addf %36, %49 : vector<1x10xf32>
    %c2_34 = arith.constant 2 : index
    %c0_35 = arith.constant 0 : index
    %c0_36 = arith.constant 0 : index
    %51 = vector.load %arg3[%c2_34, %c0_35, %c0_36] : memref<10x32x196xf32, #tpu.memory_space<vmem>>, vector<1x32x196xf32>
    %52 = vector.shape_cast %51 : vector<1x32x196xf32> to vector<32x196xf32>
    %53 = arith.mulf %21, %52 : vector<32x196xf32>
    %cst_37 = arith.constant dense<0.000000e+00> : vector<32xf32>
    %54 = vector.multi_reduction <add>, %53, %cst_37 [1] : vector<32x196xf32> to vector<32xf32>
    %55 = vector.shape_cast %54 : vector<32xf32> to vector<32x1xf32>
    %cst_38 = arith.constant dense<0.000000e+00> : vector<1xf32>
    %56 = vector.multi_reduction <add>, %55, %cst_38 [0] : vector<32x1xf32> to vector<1xf32>
    %57 = vector.shape_cast %56 : vector<1xf32> to vector<1x1xf32>
    %c2_i32 = arith.constant 2 : i32
    %58 = vector.broadcast %c2_i32 : i32 to vector<1x10xi32>
    %59 = arith.cmpi eq, %2, %58 : vector<1x10xi32>
    %cst_39 = arith.constant 0.000000e+00 : f32
    %60 = vector.shape_cast %57 : vector<1x1xf32> to vector<1x1xf32>
    %61 = vector.broadcast %60 : vector<1x1xf32> to vector<1x10xf32>
    %62 = vector.broadcast %cst_39 : f32 to vector<1x10xf32>
    %63 = arith.select %59, %61, %62 : vector<1x10xi1>, vector<1x10xf32>
    %64 = arith.addf %50, %63 : vector<1x10xf32>
    %c3_40 = arith.constant 3 : index
    %c0_41 = arith.constant 0 : index
    %c0_42 = arith.constant 0 : index
    %65 = vector.load %arg3[%c3_40, %c0_41, %c0_42] : memref<10x32x196xf32, #tpu.memory_space<vmem>>, vector<1x32x196xf32>
    %66 = vector.shape_cast %65 : vector<1x32x196xf32> to vector<32x196xf32>
    %67 = arith.mulf %21, %66 : vector<32x196xf32>
    %cst_43 = arith.constant dense<0.000000e+00> : vector<32xf32>
    %68 = vector.multi_reduction <add>, %67, %cst_43 [1] : vector<32x196xf32> to vector<32xf32>
    %69 = vector.shape_cast %68 : vector<32xf32> to vector<32x1xf32>
    %cst_44 = arith.constant dense<0.000000e+00> : vector<1xf32>
    %70 = vector.multi_reduction <add>, %69, %cst_44 [0] : vector<32x1xf32> to vector<1xf32>
    %71 = vector.shape_cast %70 : vector<1xf32> to vector<1x1xf32>
    %c3_i32 = arith.constant 3 : i32
    %72 = vector.broadcast %c3_i32 : i32 to vector<1x10xi32>
    %73 = arith.cmpi eq, %2, %72 : vector<1x10xi32>
    %cst_45 = arith.constant 0.000000e+00 : f32
    %74 = vector.shape_cast %71 : vector<1x1xf32> to vector<1x1xf32>
    %75 = vector.broadcast %74 : vector<1x1xf32> to vector<1x10xf32>
    %76 = vector.broadcast %cst_45 : f32 to vector<1x10xf32>
    %77 = arith.select %73, %75, %76 : vector<1x10xi1>, vector<1x10xf32>
    %78 = arith.addf %64, %77 : vector<1x10xf32>
    %c4 = arith.constant 4 : index
    %c0_46 = arith.constant 0 : index
    %c0_47 = arith.constant 0 : index
    %79 = vector.load %arg3[%c4, %c0_46, %c0_47] : memref<10x32x196xf32, #tpu.memory_space<vmem>>, vector<1x32x196xf32>
    %80 = vector.shape_cast %79 : vector<1x32x196xf32> to vector<32x196xf32>
    %81 = arith.mulf %21, %80 : vector<32x196xf32>
    %cst_48 = arith.constant dense<0.000000e+00> : vector<32xf32>
    %82 = vector.multi_reduction <add>, %81, %cst_48 [1] : vector<32x196xf32> to vector<32xf32>
    %83 = vector.shape_cast %82 : vector<32xf32> to vector<32x1xf32>
    %cst_49 = arith.constant dense<0.000000e+00> : vector<1xf32>
    %84 = vector.multi_reduction <add>, %83, %cst_49 [0] : vector<32x1xf32> to vector<1xf32>
    %85 = vector.shape_cast %84 : vector<1xf32> to vector<1x1xf32>
    %c4_i32 = arith.constant 4 : i32
    %86 = vector.broadcast %c4_i32 : i32 to vector<1x10xi32>
    %87 = arith.cmpi eq, %2, %86 : vector<1x10xi32>
    %cst_50 = arith.constant 0.000000e+00 : f32
    %88 = vector.shape_cast %85 : vector<1x1xf32> to vector<1x1xf32>
    %89 = vector.broadcast %88 : vector<1x1xf32> to vector<1x10xf32>
    %90 = vector.broadcast %cst_50 : f32 to vector<1x10xf32>
    %91 = arith.select %87, %89, %90 : vector<1x10xi1>, vector<1x10xf32>
    %92 = arith.addf %78, %91 : vector<1x10xf32>
    %c5 = arith.constant 5 : index
    %c0_51 = arith.constant 0 : index
    %c0_52 = arith.constant 0 : index
    %93 = vector.load %arg3[%c5, %c0_51, %c0_52] : memref<10x32x196xf32, #tpu.memory_space<vmem>>, vector<1x32x196xf32>
    %94 = vector.shape_cast %93 : vector<1x32x196xf32> to vector<32x196xf32>
    %95 = arith.mulf %21, %94 : vector<32x196xf32>
    %cst_53 = arith.constant dense<0.000000e+00> : vector<32xf32>
    %96 = vector.multi_reduction <add>, %95, %cst_53 [1] : vector<32x196xf32> to vector<32xf32>
    %97 = vector.shape_cast %96 : vector<32xf32> to vector<32x1xf32>
    %cst_54 = arith.constant dense<0.000000e+00> : vector<1xf32>
    %98 = vector.multi_reduction <add>, %97, %cst_54 [0] : vector<32x1xf32> to vector<1xf32>
    %99 = vector.shape_cast %98 : vector<1xf32> to vector<1x1xf32>
    %c5_i32 = arith.constant 5 : i32
    %100 = vector.broadcast %c5_i32 : i32 to vector<1x10xi32>
    %101 = arith.cmpi eq, %2, %100 : vector<1x10xi32>
    %cst_55 = arith.constant 0.000000e+00 : f32
    %102 = vector.shape_cast %99 : vector<1x1xf32> to vector<1x1xf32>
    %103 = vector.broadcast %102 : vector<1x1xf32> to vector<1x10xf32>
    %104 = vector.broadcast %cst_55 : f32 to vector<1x10xf32>
    %105 = arith.select %101, %103, %104 : vector<1x10xi1>, vector<1x10xf32>
    %106 = arith.addf %92, %105 : vector<1x10xf32>
    %c6 = arith.constant 6 : index
    %c0_56 = arith.constant 0 : index
    %c0_57 = arith.constant 0 : index
    %107 = vector.load %arg3[%c6, %c0_56, %c0_57] : memref<10x32x196xf32, #tpu.memory_space<vmem>>, vector<1x32x196xf32>
    %108 = vector.shape_cast %107 : vector<1x32x196xf32> to vector<32x196xf32>
    %109 = arith.mulf %21, %108 : vector<32x196xf32>
    %cst_58 = arith.constant dense<0.000000e+00> : vector<32xf32>
    %110 = vector.multi_reduction <add>, %109, %cst_58 [1] : vector<32x196xf32> to vector<32xf32>
    %111 = vector.shape_cast %110 : vector<32xf32> to vector<32x1xf32>
    %cst_59 = arith.constant dense<0.000000e+00> : vector<1xf32>
    %112 = vector.multi_reduction <add>, %111, %cst_59 [0] : vector<32x1xf32> to vector<1xf32>
    %113 = vector.shape_cast %112 : vector<1xf32> to vector<1x1xf32>
    %c6_i32 = arith.constant 6 : i32
    %114 = vector.broadcast %c6_i32 : i32 to vector<1x10xi32>
    %115 = arith.cmpi eq, %2, %114 : vector<1x10xi32>
    %cst_60 = arith.constant 0.000000e+00 : f32
    %116 = vector.shape_cast %113 : vector<1x1xf32> to vector<1x1xf32>
    %117 = vector.broadcast %116 : vector<1x1xf32> to vector<1x10xf32>
    %118 = vector.broadcast %cst_60 : f32 to vector<1x10xf32>
    %119 = arith.select %115, %117, %118 : vector<1x10xi1>, vector<1x10xf32>
    %120 = arith.addf %106, %119 : vector<1x10xf32>
    %c7 = arith.constant 7 : index
    %c0_61 = arith.constant 0 : index
    %c0_62 = arith.constant 0 : index
    %121 = vector.load %arg3[%c7, %c0_61, %c0_62] : memref<10x32x196xf32, #tpu.memory_space<vmem>>, vector<1x32x196xf32>
    %122 = vector.shape_cast %121 : vector<1x32x196xf32> to vector<32x196xf32>
    %123 = arith.mulf %21, %122 : vector<32x196xf32>
    %cst_63 = arith.constant dense<0.000000e+00> : vector<32xf32>
    %124 = vector.multi_reduction <add>, %123, %cst_63 [1] : vector<32x196xf32> to vector<32xf32>
    %125 = vector.shape_cast %124 : vector<32xf32> to vector<32x1xf32>
    %cst_64 = arith.constant dense<0.000000e+00> : vector<1xf32>
    %126 = vector.multi_reduction <add>, %125, %cst_64 [0] : vector<32x1xf32> to vector<1xf32>
    %127 = vector.shape_cast %126 : vector<1xf32> to vector<1x1xf32>
    %c7_i32 = arith.constant 7 : i32
    %128 = vector.broadcast %c7_i32 : i32 to vector<1x10xi32>
    %129 = arith.cmpi eq, %2, %128 : vector<1x10xi32>
    %cst_65 = arith.constant 0.000000e+00 : f32
    %130 = vector.shape_cast %127 : vector<1x1xf32> to vector<1x1xf32>
    %131 = vector.broadcast %130 : vector<1x1xf32> to vector<1x10xf32>
    %132 = vector.broadcast %cst_65 : f32 to vector<1x10xf32>
    %133 = arith.select %129, %131, %132 : vector<1x10xi1>, vector<1x10xf32>
    %134 = arith.addf %120, %133 : vector<1x10xf32>
    %c8 = arith.constant 8 : index
    %c0_66 = arith.constant 0 : index
    %c0_67 = arith.constant 0 : index
    %135 = vector.load %arg3[%c8, %c0_66, %c0_67] : memref<10x32x196xf32, #tpu.memory_space<vmem>>, vector<1x32x196xf32>
    %136 = vector.shape_cast %135 : vector<1x32x196xf32> to vector<32x196xf32>
    %137 = arith.mulf %21, %136 : vector<32x196xf32>
    %cst_68 = arith.constant dense<0.000000e+00> : vector<32xf32>
    %138 = vector.multi_reduction <add>, %137, %cst_68 [1] : vector<32x196xf32> to vector<32xf32>
    %139 = vector.shape_cast %138 : vector<32xf32> to vector<32x1xf32>
    %cst_69 = arith.constant dense<0.000000e+00> : vector<1xf32>
    %140 = vector.multi_reduction <add>, %139, %cst_69 [0] : vector<32x1xf32> to vector<1xf32>
    %141 = vector.shape_cast %140 : vector<1xf32> to vector<1x1xf32>
    %c8_i32 = arith.constant 8 : i32
    %142 = vector.broadcast %c8_i32 : i32 to vector<1x10xi32>
    %143 = arith.cmpi eq, %2, %142 : vector<1x10xi32>
    %cst_70 = arith.constant 0.000000e+00 : f32
    %144 = vector.shape_cast %141 : vector<1x1xf32> to vector<1x1xf32>
    %145 = vector.broadcast %144 : vector<1x1xf32> to vector<1x10xf32>
    %146 = vector.broadcast %cst_70 : f32 to vector<1x10xf32>
    %147 = arith.select %143, %145, %146 : vector<1x10xi1>, vector<1x10xf32>
    %148 = arith.addf %134, %147 : vector<1x10xf32>
    %c9 = arith.constant 9 : index
    %c0_71 = arith.constant 0 : index
    %c0_72 = arith.constant 0 : index
    %149 = vector.load %arg3[%c9, %c0_71, %c0_72] : memref<10x32x196xf32, #tpu.memory_space<vmem>>, vector<1x32x196xf32>
    %150 = vector.shape_cast %149 : vector<1x32x196xf32> to vector<32x196xf32>
    %151 = arith.mulf %21, %150 : vector<32x196xf32>
    %cst_73 = arith.constant dense<0.000000e+00> : vector<32xf32>
    %152 = vector.multi_reduction <add>, %151, %cst_73 [1] : vector<32x196xf32> to vector<32xf32>
    %153 = vector.shape_cast %152 : vector<32xf32> to vector<32x1xf32>
    %cst_74 = arith.constant dense<0.000000e+00> : vector<1xf32>
    %154 = vector.multi_reduction <add>, %153, %cst_74 [0] : vector<32x1xf32> to vector<1xf32>
    %155 = vector.shape_cast %154 : vector<1xf32> to vector<1x1xf32>
    %c9_i32 = arith.constant 9 : i32
    %156 = vector.broadcast %c9_i32 : i32 to vector<1x10xi32>
    %157 = arith.cmpi eq, %2, %156 : vector<1x10xi32>
    %cst_75 = arith.constant 0.000000e+00 : f32
    %158 = vector.shape_cast %155 : vector<1x1xf32> to vector<1x1xf32>
    %159 = vector.broadcast %158 : vector<1x1xf32> to vector<1x10xf32>
    %160 = vector.broadcast %cst_75 : f32 to vector<1x10xf32>
    %161 = arith.select %157, %159, %160 : vector<1x10xi1>, vector<1x10xf32>
    %162 = arith.addf %148, %161 : vector<1x10xf32>
    %c0_76 = arith.constant 0 : index
    %c0_77 = arith.constant 0 : index
    %163 = vector.load %arg5[%c0_76, %c0_77] : memref<2x10xf32, #tpu.memory_space<vmem>>, vector<1x10xf32>
    tpu.vector_store %arg5[%c0_76, %c0_77], %162 {strides = array<i32>} : memref<2x10xf32, #tpu.memory_space<vmem>>, vector<1x10xf32>,
    %c1_78 = arith.constant 1 : index
    %c0_79 = arith.constant 0 : index
    %c0_80 = arith.constant 0 : index
    %c0_81 = arith.constant 0 : index
    %164 = vector.load %arg0[%c1_78, %c0_79, %c0_80, %c0_81] : memref<2x4x16x196xf32, #tpu.memory_space<vmem>>, vector<1x1x16x196xf32>
    %165 = vector.shape_cast %164 : vector<1x1x16x196xf32> to vector<16x196xf32>
    %cst_82 = arith.constant dense<0.000000e+00> : vector<32x196xf32>
    %166 = tpu.matmul %0, %165, %cst_82 {dimension_numbers = #tpu.dot_dimension_numbers<[1], [0], [0], [1], [0, 0, 1, 1], [], []>} : vector<32x16xf32>, vector<16x196xf32>, vector<32x196xf32> -> vector<32x196xf32>
    %c1_83 = arith.constant 1 : index
    %c1_84 = arith.constant 1 : index
    %c0_85 = arith.constant 0 : index
    %c0_86 = arith.constant 0 : index
    %167 = vector.load %arg0[%c1_83, %c1_84, %c0_85, %c0_86] : memref<2x4x16x196xf32, #tpu.memory_space<vmem>>, vector<1x1x16x196xf32>
    %168 = vector.shape_cast %167 : vector<1x1x16x196xf32> to vector<16x196xf32>
    %cst_87 = arith.constant dense<0.000000e+00> : vector<32x196xf32>
    %169 = tpu.matmul %0, %168, %cst_87 {dimension_numbers = #tpu.dot_dimension_numbers<[1], [0], [0], [1], [0, 0, 1, 1], [], []>} : vector<32x16xf32>, vector<16x196xf32>, vector<32x196xf32> -> vector<32x196xf32>
    %170 = arith.maximumf %166, %169 : vector<32x196xf32>
    %c1_88 = arith.constant 1 : index
    %c2_89 = arith.constant 2 : index
    %c0_90 = arith.constant 0 : index
    %c0_91 = arith.constant 0 : index
    %171 = vector.load %arg0[%c1_88, %c2_89, %c0_90, %c0_91] : memref<2x4x16x196xf32, #tpu.memory_space<vmem>>, vector<1x1x16x196xf32>
    %172 = vector.shape_cast %171 : vector<1x1x16x196xf32> to vector<16x196xf32>
    %cst_92 = arith.constant dense<0.000000e+00> : vector<32x196xf32>
    %173 = tpu.matmul %0, %172, %cst_92 {dimension_numbers = #tpu.dot_dimension_numbers<[1], [0], [0], [1], [0, 0, 1, 1], [], []>} : vector<32x16xf32>, vector<16x196xf32>, vector<32x196xf32> -> vector<32x196xf32>
    %174 = arith.maximumf %170, %173 : vector<32x196xf32>
    %c1_93 = arith.constant 1 : index
    %c3_94 = arith.constant 3 : index
    %c0_95 = arith.constant 0 : index
    %c0_96 = arith.constant 0 : index
    %175 = vector.load %arg0[%c1_93, %c3_94, %c0_95, %c0_96] : memref<2x4x16x196xf32, #tpu.memory_space<vmem>>, vector<1x1x16x196xf32>
    %176 = vector.shape_cast %175 : vector<1x1x16x196xf32> to vector<16x196xf32>
    %cst_97 = arith.constant dense<0.000000e+00> : vector<32x196xf32>
    %177 = tpu.matmul %0, %176, %cst_97 {dimension_numbers = #tpu.dot_dimension_numbers<[1], [0], [0], [1], [0, 0, 1, 1], [], []>} : vector<32x16xf32>, vector<16x196xf32>, vector<32x196xf32> -> vector<32x196xf32>
    %178 = arith.maximumf %174, %177 : vector<32x196xf32>
    %179 = vector.broadcast %1 : vector<32x1xf32> to vector<32x196xf32>
    %180 = arith.addf %178, %179 : vector<32x196xf32>
    %cst_98 = arith.constant 0.000000e+00 : f32
    %181 = vector.broadcast %cst_98 : f32 to vector<32x196xf32>
    %182 = arith.maximumf %180, %181 : vector<32x196xf32>
    %c0_99 = arith.constant 0 : index
    %c0_100 = arith.constant 0 : index
    %183 = vector.load %arg4[%c0_99, %c0_100] : memref<1x10xf32, #tpu.memory_space<vmem>>, vector<1x10xf32>
    %c0_101 = arith.constant 0 : index
    %c0_102 = arith.constant 0 : index
    %c0_103 = arith.constant 0 : index
    %184 = vector.load %arg3[%c0_101, %c0_102, %c0_103] : memref<10x32x196xf32, #tpu.memory_space<vmem>>, vector<1x32x196xf32>
    %185 = vector.shape_cast %184 : vector<1x32x196xf32> to vector<32x196xf32>
    %186 = arith.mulf %182, %185 : vector<32x196xf32>
    %cst_104 = arith.constant dense<0.000000e+00> : vector<32xf32>
    %187 = vector.multi_reduction <add>, %186, %cst_104 [1] : vector<32x196xf32> to vector<32xf32>
    %188 = vector.shape_cast %187 : vector<32xf32> to vector<32x1xf32>
    %cst_105 = arith.constant dense<0.000000e+00> : vector<1xf32>
    %189 = vector.multi_reduction <add>, %188, %cst_105 [0] : vector<32x1xf32> to vector<1xf32>
    %190 = vector.shape_cast %189 : vector<1xf32> to vector<1x1xf32>
    %c0_i32_106 = arith.constant 0 : i32
    %191 = vector.broadcast %c0_i32_106 : i32 to vector<1x10xi32>
    %192 = arith.cmpi eq, %2, %191 : vector<1x10xi32>
    %cst_107 = arith.constant 0.000000e+00 : f32
    %193 = vector.shape_cast %190 : vector<1x1xf32> to vector<1x1xf32>
    %194 = vector.broadcast %193 : vector<1x1xf32> to vector<1x10xf32>
    %195 = vector.broadcast %cst_107 : f32 to vector<1x10xf32>
    %196 = arith.select %192, %194, %195 : vector<1x10xi1>, vector<1x10xf32>
    %197 = arith.addf %183, %196 : vector<1x10xf32>
    %c1_108 = arith.constant 1 : index
    %c0_109 = arith.constant 0 : index
    %c0_110 = arith.constant 0 : index
    %198 = vector.load %arg3[%c1_108, %c0_109, %c0_110] : memref<10x32x196xf32, #tpu.memory_space<vmem>>, vector<1x32x196xf32>
    %199 = vector.shape_cast %198 : vector<1x32x196xf32> to vector<32x196xf32>
    %200 = arith.mulf %182, %199 : vector<32x196xf32>
    %cst_111 = arith.constant dense<0.000000e+00> : vector<32xf32>
    %201 = vector.multi_reduction <add>, %200, %cst_111 [1] : vector<32x196xf32> to vector<32xf32>
    %202 = vector.shape_cast %201 : vector<32xf32> to vector<32x1xf32>
    %cst_112 = arith.constant dense<0.000000e+00> : vector<1xf32>
    %203 = vector.multi_reduction <add>, %202, %cst_112 [0] : vector<32x1xf32> to vector<1xf32>
    %204 = vector.shape_cast %203 : vector<1xf32> to vector<1x1xf32>
    %c1_i32_113 = arith.constant 1 : i32
    %205 = vector.broadcast %c1_i32_113 : i32 to vector<1x10xi32>
    %206 = arith.cmpi eq, %2, %205 : vector<1x10xi32>
    %cst_114 = arith.constant 0.000000e+00 : f32
    %207 = vector.shape_cast %204 : vector<1x1xf32> to vector<1x1xf32>
    %208 = vector.broadcast %207 : vector<1x1xf32> to vector<1x10xf32>
    %209 = vector.broadcast %cst_114 : f32 to vector<1x10xf32>
    %210 = arith.select %206, %208, %209 : vector<1x10xi1>, vector<1x10xf32>
    %211 = arith.addf %197, %210 : vector<1x10xf32>
    %c2_115 = arith.constant 2 : index
    %c0_116 = arith.constant 0 : index
    %c0_117 = arith.constant 0 : index
    %212 = vector.load %arg3[%c2_115, %c0_116, %c0_117] : memref<10x32x196xf32, #tpu.memory_space<vmem>>, vector<1x32x196xf32>
    %213 = vector.shape_cast %212 : vector<1x32x196xf32> to vector<32x196xf32>
    %214 = arith.mulf %182, %213 : vector<32x196xf32>
    %cst_118 = arith.constant dense<0.000000e+00> : vector<32xf32>
    %215 = vector.multi_reduction <add>, %214, %cst_118 [1] : vector<32x196xf32> to vector<32xf32>
    %216 = vector.shape_cast %215 : vector<32xf32> to vector<32x1xf32>
    %cst_119 = arith.constant dense<0.000000e+00> : vector<1xf32>
    %217 = vector.multi_reduction <add>, %216, %cst_119 [0] : vector<32x1xf32> to vector<1xf32>
    %218 = vector.shape_cast %217 : vector<1xf32> to vector<1x1xf32>
    %c2_i32_120 = arith.constant 2 : i32
    %219 = vector.broadcast %c2_i32_120 : i32 to vector<1x10xi32>
    %220 = arith.cmpi eq, %2, %219 : vector<1x10xi32>
    %cst_121 = arith.constant 0.000000e+00 : f32
    %221 = vector.shape_cast %218 : vector<1x1xf32> to vector<1x1xf32>
    %222 = vector.broadcast %221 : vector<1x1xf32> to vector<1x10xf32>
    %223 = vector.broadcast %cst_121 : f32 to vector<1x10xf32>
    %224 = arith.select %220, %222, %223 : vector<1x10xi1>, vector<1x10xf32>
    %225 = arith.addf %211, %224 : vector<1x10xf32>
    %c3_122 = arith.constant 3 : index
    %c0_123 = arith.constant 0 : index
    %c0_124 = arith.constant 0 : index
    %226 = vector.load %arg3[%c3_122, %c0_123, %c0_124] : memref<10x32x196xf32, #tpu.memory_space<vmem>>, vector<1x32x196xf32>
    %227 = vector.shape_cast %226 : vector<1x32x196xf32> to vector<32x196xf32>
    %228 = arith.mulf %182, %227 : vector<32x196xf32>
    %cst_125 = arith.constant dense<0.000000e+00> : vector<32xf32>
    %229 = vector.multi_reduction <add>, %228, %cst_125 [1] : vector<32x196xf32> to vector<32xf32>
    %230 = vector.shape_cast %229 : vector<32xf32> to vector<32x1xf32>
    %cst_126 = arith.constant dense<0.000000e+00> : vector<1xf32>
    %231 = vector.multi_reduction <add>, %230, %cst_126 [0] : vector<32x1xf32> to vector<1xf32>
    %232 = vector.shape_cast %231 : vector<1xf32> to vector<1x1xf32>
    %c3_i32_127 = arith.constant 3 : i32
    %233 = vector.broadcast %c3_i32_127 : i32 to vector<1x10xi32>
    %234 = arith.cmpi eq, %2, %233 : vector<1x10xi32>
    %cst_128 = arith.constant 0.000000e+00 : f32
    %235 = vector.shape_cast %232 : vector<1x1xf32> to vector<1x1xf32>
    %236 = vector.broadcast %235 : vector<1x1xf32> to vector<1x10xf32>
    %237 = vector.broadcast %cst_128 : f32 to vector<1x10xf32>
    %238 = arith.select %234, %236, %237 : vector<1x10xi1>, vector<1x10xf32>
    %239 = arith.addf %225, %238 : vector<1x10xf32>
    %c4_129 = arith.constant 4 : index
    %c0_130 = arith.constant 0 : index
    %c0_131 = arith.constant 0 : index
    %240 = vector.load %arg3[%c4_129, %c0_130, %c0_131] : memref<10x32x196xf32, #tpu.memory_space<vmem>>, vector<1x32x196xf32>
    %241 = vector.shape_cast %240 : vector<1x32x196xf32> to vector<32x196xf32>
    %242 = arith.mulf %182, %241 : vector<32x196xf32>
    %cst_132 = arith.constant dense<0.000000e+00> : vector<32xf32>
    %243 = vector.multi_reduction <add>, %242, %cst_132 [1] : vector<32x196xf32> to vector<32xf32>
    %244 = vector.shape_cast %243 : vector<32xf32> to vector<32x1xf32>
    %cst_133 = arith.constant dense<0.000000e+00> : vector<1xf32>
    %245 = vector.multi_reduction <add>, %244, %cst_133 [0] : vector<32x1xf32> to vector<1xf32>
    %246 = vector.shape_cast %245 : vector<1xf32> to vector<1x1xf32>
    %c4_i32_134 = arith.constant 4 : i32
    %247 = vector.broadcast %c4_i32_134 : i32 to vector<1x10xi32>
    %248 = arith.cmpi eq, %2, %247 : vector<1x10xi32>
    %cst_135 = arith.constant 0.000000e+00 : f32
    %249 = vector.shape_cast %246 : vector<1x1xf32> to vector<1x1xf32>
    %250 = vector.broadcast %249 : vector<1x1xf32> to vector<1x10xf32>
    %251 = vector.broadcast %cst_135 : f32 to vector<1x10xf32>
    %252 = arith.select %248, %250, %251 : vector<1x10xi1>, vector<1x10xf32>
    %253 = arith.addf %239, %252 : vector<1x10xf32>
    %c5_136 = arith.constant 5 : index
    %c0_137 = arith.constant 0 : index
    %c0_138 = arith.constant 0 : index
    %254 = vector.load %arg3[%c5_136, %c0_137, %c0_138] : memref<10x32x196xf32, #tpu.memory_space<vmem>>, vector<1x32x196xf32>
    %255 = vector.shape_cast %254 : vector<1x32x196xf32> to vector<32x196xf32>
    %256 = arith.mulf %182, %255 : vector<32x196xf32>
    %cst_139 = arith.constant dense<0.000000e+00> : vector<32xf32>
    %257 = vector.multi_reduction <add>, %256, %cst_139 [1] : vector<32x196xf32> to vector<32xf32>
    %258 = vector.shape_cast %257 : vector<32xf32> to vector<32x1xf32>
    %cst_140 = arith.constant dense<0.000000e+00> : vector<1xf32>
    %259 = vector.multi_reduction <add>, %258, %cst_140 [0] : vector<32x1xf32> to vector<1xf32>
    %260 = vector.shape_cast %259 : vector<1xf32> to vector<1x1xf32>
    %c5_i32_141 = arith.constant 5 : i32
    %261 = vector.broadcast %c5_i32_141 : i32 to vector<1x10xi32>
    %262 = arith.cmpi eq, %2, %261 : vector<1x10xi32>
    %cst_142 = arith.constant 0.000000e+00 : f32
    %263 = vector.shape_cast %260 : vector<1x1xf32> to vector<1x1xf32>
    %264 = vector.broadcast %263 : vector<1x1xf32> to vector<1x10xf32>
    %265 = vector.broadcast %cst_142 : f32 to vector<1x10xf32>
    %266 = arith.select %262, %264, %265 : vector<1x10xi1>, vector<1x10xf32>
    %267 = arith.addf %253, %266 : vector<1x10xf32>
    %c6_143 = arith.constant 6 : index
    %c0_144 = arith.constant 0 : index
    %c0_145 = arith.constant 0 : index
    %268 = vector.load %arg3[%c6_143, %c0_144, %c0_145] : memref<10x32x196xf32, #tpu.memory_space<vmem>>, vector<1x32x196xf32>
    %269 = vector.shape_cast %268 : vector<1x32x196xf32> to vector<32x196xf32>
    %270 = arith.mulf %182, %269 : vector<32x196xf32>
    %cst_146 = arith.constant dense<0.000000e+00> : vector<32xf32>
    %271 = vector.multi_reduction <add>, %270, %cst_146 [1] : vector<32x196xf32> to vector<32xf32>
    %272 = vector.shape_cast %271 : vector<32xf32> to vector<32x1xf32>
    %cst_147 = arith.constant dense<0.000000e+00> : vector<1xf32>
    %273 = vector.multi_reduction <add>, %272, %cst_147 [0] : vector<32x1xf32> to vector<1xf32>
    %274 = vector.shape_cast %273 : vector<1xf32> to vector<1x1xf32>
    %c6_i32_148 = arith.constant 6 : i32
    %275 = vector.broadcast %c6_i32_148 : i32 to vector<1x10xi32>
    %276 = arith.cmpi eq, %2, %275 : vector<1x10xi32>
    %cst_149 = arith.constant 0.000000e+00 : f32
    %277 = vector.shape_cast %274 : vector<1x1xf32> to vector<1x1xf32>
    %278 = vector.broadcast %277 : vector<1x1xf32> to vector<1x10xf32>
    %279 = vector.broadcast %cst_149 : f32 to vector<1x10xf32>
    %280 = arith.select %276, %278, %279 : vector<1x10xi1>, vector<1x10xf32>
    %281 = arith.addf %267, %280 : vector<1x10xf32>
    %c7_150 = arith.constant 7 : index
    %c0_151 = arith.constant 0 : index
    %c0_152 = arith.constant 0 : index
    %282 = vector.load %arg3[%c7_150, %c0_151, %c0_152] : memref<10x32x196xf32, #tpu.memory_space<vmem>>, vector<1x32x196xf32>
    %283 = vector.shape_cast %282 : vector<1x32x196xf32> to vector<32x196xf32>
    %284 = arith.mulf %182, %283 : vector<32x196xf32>
    %cst_153 = arith.constant dense<0.000000e+00> : vector<32xf32>
    %285 = vector.multi_reduction <add>, %284, %cst_153 [1] : vector<32x196xf32> to vector<32xf32>
    %286 = vector.shape_cast %285 : vector<32xf32> to vector<32x1xf32>
    %cst_154 = arith.constant dense<0.000000e+00> : vector<1xf32>
    %287 = vector.multi_reduction <add>, %286, %cst_154 [0] : vector<32x1xf32> to vector<1xf32>
    %288 = vector.shape_cast %287 : vector<1xf32> to vector<1x1xf32>
    %c7_i32_155 = arith.constant 7 : i32
    %289 = vector.broadcast %c7_i32_155 : i32 to vector<1x10xi32>
    %290 = arith.cmpi eq, %2, %289 : vector<1x10xi32>
    %cst_156 = arith.constant 0.000000e+00 : f32
    %291 = vector.shape_cast %288 : vector<1x1xf32> to vector<1x1xf32>
    %292 = vector.broadcast %291 : vector<1x1xf32> to vector<1x10xf32>
    %293 = vector.broadcast %cst_156 : f32 to vector<1x10xf32>
    %294 = arith.select %290, %292, %293 : vector<1x10xi1>, vector<1x10xf32>
    %295 = arith.addf %281, %294 : vector<1x10xf32>
    %c8_157 = arith.constant 8 : index
    %c0_158 = arith.constant 0 : index
    %c0_159 = arith.constant 0 : index
    %296 = vector.load %arg3[%c8_157, %c0_158, %c0_159] : memref<10x32x196xf32, #tpu.memory_space<vmem>>, vector<1x32x196xf32>
    %297 = vector.shape_cast %296 : vector<1x32x196xf32> to vector<32x196xf32>
    %298 = arith.mulf %182, %297 : vector<32x196xf32>
    %cst_160 = arith.constant dense<0.000000e+00> : vector<32xf32>
    %299 = vector.multi_reduction <add>, %298, %cst_160 [1] : vector<32x196xf32> to vector<32xf32>
    %300 = vector.shape_cast %299 : vector<32xf32> to vector<32x1xf32>
    %cst_161 = arith.constant dense<0.000000e+00> : vector<1xf32>
    %301 = vector.multi_reduction <add>, %300, %cst_161 [0] : vector<32x1xf32> to vector<1xf32>
    %302 = vector.shape_cast %301 : vector<1xf32> to vector<1x1xf32>
    %c8_i32_162 = arith.constant 8 : i32
    %303 = vector.broadcast %c8_i32_162 : i32 to vector<1x10xi32>
    %304 = arith.cmpi eq, %2, %303 : vector<1x10xi32>
    %cst_163 = arith.constant 0.000000e+00 : f32
    %305 = vector.shape_cast %302 : vector<1x1xf32> to vector<1x1xf32>
    %306 = vector.broadcast %305 : vector<1x1xf32> to vector<1x10xf32>
    %307 = vector.broadcast %cst_163 : f32 to vector<1x10xf32>
    %308 = arith.select %304, %306, %307 : vector<1x10xi1>, vector<1x10xf32>
    %309 = arith.addf %295, %308 : vector<1x10xf32>
    %c9_164 = arith.constant 9 : index
    %c0_165 = arith.constant 0 : index
    %c0_166 = arith.constant 0 : index
    %310 = vector.load %arg3[%c9_164, %c0_165, %c0_166] : memref<10x32x196xf32, #tpu.memory_space<vmem>>, vector<1x32x196xf32>
    %311 = vector.shape_cast %310 : vector<1x32x196xf32> to vector<32x196xf32>
    %312 = arith.mulf %182, %311 : vector<32x196xf32>
    %cst_167 = arith.constant dense<0.000000e+00> : vector<32xf32>
    %313 = vector.multi_reduction <add>, %312, %cst_167 [1] : vector<32x196xf32> to vector<32xf32>
    %314 = vector.shape_cast %313 : vector<32xf32> to vector<32x1xf32>
    %cst_168 = arith.constant dense<0.000000e+00> : vector<1xf32>
    %315 = vector.multi_reduction <add>, %314, %cst_168 [0] : vector<32x1xf32> to vector<1xf32>
    %316 = vector.shape_cast %315 : vector<1xf32> to vector<1x1xf32>
    %c9_i32_169 = arith.constant 9 : i32
    %317 = vector.broadcast %c9_i32_169 : i32 to vector<1x10xi32>
    %318 = arith.cmpi eq, %2, %317 : vector<1x10xi32>
    %cst_170 = arith.constant 0.000000e+00 : f32
    %319 = vector.shape_cast %316 : vector<1x1xf32> to vector<1x1xf32>
    %320 = vector.broadcast %319 : vector<1x1xf32> to vector<1x10xf32>
    %321 = vector.broadcast %cst_170 : f32 to vector<1x10xf32>
    %322 = arith.select %318, %320, %321 : vector<1x10xi1>, vector<1x10xf32>
    %323 = arith.addf %309, %322 : vector<1x10xf32>
    %c1_171 = arith.constant 1 : index
    %c0_172 = arith.constant 0 : index
    %324 = vector.load %arg5[%c1_171, %c0_172] : memref<2x10xf32, #tpu.memory_space<vmem>>, vector<1x10xf32>
    tpu.vector_store %arg5[%c1_171, %c0_172], %323 {strides = array<i32>} : memref<2x10xf32, #tpu.memory_space<vmem>>, vector<1x10xf32>,
    return
  }
}

</mosaic_0001>

<bundles_post_ra>
// kernel: simple_cnn_forward.1
= control target key start
LH: loop header
LB: loop body
LE: loop exit
PB: predicated region body
PF: predicated region fallthrough
CT: control target
= control target key end

     0   :  { %v2059_v7 = vmov 0.0   ;;  %v2060_v13 = vmov 0   ;;  %vm35_vm0 = vcmask 130048   ;;  %s3511_s0 = inlined_call_operand.vmem [shape: f32[2,4,16,196], index: 0, kind: input, shape index: {}]   ;;  %s3512_s1 = inlined_call_operand.vmem [shape: f32[32,16], index: 1, kind: input, shape index: {}]   ;;  %s3513_s2 = inlined_call_operand.vmem [shape: f32[32,1], index: 2, kind: input, shape index: {}]   ;;  %s3514_s3 = inlined_call_operand.vmem [shape: f32[10,32,196], index: 3, kind: input, shape index: {}]   ;;  %s3515_s4 = inlined_call_operand.vmem [shape: f32[1,10], index: 4, kind: input, shape index: {}]   ;;  %s3516_s5 = inlined_call_operand.hbm [shape: f32[2,10], index: 5, kind: output, shape index: {}]  }
   0x1   :  { %v32_v0 = vld [vmem:[%s3511_s0 + $0x8] sm:$0xff]  ;;  %v34_v1 = vld [vmem:[%s3511_s0 + $0x18] sm:$0xff]  ;;  %v31_v5 = vld [vmem:[%s3511_s0] sm:$0xff]  ;;  %112 = vmatprep.mubr.f32.mxu0 %v2059_v7  ;;  %206 = vmatprep.mubr.f32.mxu1 %v2059_v7 }
   0x2   :  { %v1799_v2 = vld [vmem:[%s3511_s0 + $0x28] sm:$0xff]  ;;  %v1998_v3 = vpack.c.bf16 %v34_v1, %v32_v0  ;;  %v1801_v4 = vld [vmem:[%s3511_s0 + $0x38] sm:$0xff]  ;;  %v33_v6 = vld [vmem:[%s3511_s0 + $0x10] sm:$0xff]  ;;  %2033 = vset.pattern.permute.xlu0 %v2060_v13  ;;  %2034 = vset.pattern.permute.xlu1 %v2060_v13 }
   0x3   :  { %v2002_v8 = vpack.c.bf16 %v1801_v4, %v1799_v2  ;;  %v2000_v9 = vpack.c.bf16 %v33_v6, %v31_v5  ;;  %v1798_v10 = vld [vmem:[%s3511_s0 + $0x20] sm:$0xff]  ;;  %v1800_v11 = vld [vmem:[%s3511_s0 + $0x30] sm:$0xff]  ;;  %v1807_v15 = vld [vmem:[%s3511_s0 + $0x48] sm:$0xff] }
   0x4   :  { %v2121_v12 = vld [vmem:[%s3512_s1] sm:$0xff]  ;;  %1999 = vmatprep.subr.bf16.mxu0 %v1998_v3  ;;  %v2004_v14 = vpack.c.bf16 %v1800_v11, %v1798_v10  ;;  %v1809_v16 = vld [vmem:[%s3511_s0 + $0x58] sm:$0xff]  ;;  %v1808_v19 = vld [vmem:[%s3511_s0 + $0x50] sm:$0xff] }
   0x5   :  { %v1806_v17 = vld [vmem:[%s3511_s0 + $0x40] sm:$0xff]  ;;  %2003 = vmatprep.subr.bf16.mxu1 %v2002_v8  ;;  %2001 = vmatpush1.bf16.msra.mxu0 %v2000_v9  ;;  %v2006_v18 = vpack.c.bf16 %v1809_v16, %v1807_v15  ;;  %v1815_v20 = vld [vmem:[%s3511_s0 + $0x68] sm:$0xff]  ;;  %v1817_v21 = vld [vmem:[%s3511_s0 + $0x78] sm:$0xff] }
   0x6   :  { %2005 = vmatpush1.bf16.msra.mxu1 %v2004_v14  ;;  %v2008_v22 = vpack.c.bf16 %v1808_v19, %v1806_v17  ;;  %v2010_v23 = vpack.c.bf16 %v1817_v21, %v1815_v20  ;;  %v1814_v24 = vld [vmem:[%s3511_s0 + $0x60] sm:$0xff]  ;;  %v1816_v25 = vld [vmem:[%s3511_s0 + $0x70] sm:$0xff]  ;;  %v1895_v27 = vld [vmem:[%s3511_s0 + $0x88] sm:$0xff] }
   0x7   :  { %2007 = vmatprep.subr.bf16.mxu0 %v2006_v18  ;;  %v2012_v26 = vpack.c.bf16 %v1816_v25, %v1814_v24  ;;  %v1897_v28 = vld [vmem:[%s3511_s0 + $0x98] sm:$0xff]  ;;  %v2160_v29 = vld [vmem:[%s3512_s1 + $0x8] sm:$0xff]  ;;  %v2178_v34 = vld [vmem:[%s3512_s1 + $0x10] sm:$0xff] }
   0x8   :  { %1794 = vmatmul.mubr.msk.f32.vlgmr.msra.gmra.mrb[0].mxu0 %vm35_vm0, %v2121_v12  ;;  %2011 = vmatprep.subr.bf16.mxu1 %v2010_v23  ;;  %v2014_v30 = vpack.c.bf16 %v1897_v28, %v1895_v27  ;;  %v1903_v31 = vld [vmem:[%s3511_s0 + $0xa8] sm:$0xff]  ;;  %v1905_v32 = vld [vmem:[%s3511_s0 + $0xb8] sm:$0xff]  ;;  %v25_v35 = vld [vmem:[%s3513_s2] sm:$0xff] }
   0x9   :  { %1802 = vmatmul.mubr.msk.f32.vlgmr.msra.gmra.mrb[0].mxu1 %vm35_vm0, %v2121_v12  ;;  %2009 = vmatpush1.bf16.msra.mxu0 %v2008_v22  ;;  %v2018_v33 = vpack.c.bf16 %v1905_v32, %v1903_v31  ;;  %v27_v36 = vld [vmem:[%s3513_s2 + $0x10] sm:$0xff] }
   0xa   :  { %118 = vmatprep.mubr.f32.mxu0 %v2059_v7  ;;  %212 = vmatprep.mubr.f32.mxu1 %v2059_v7 }
   0xb   :  { %2013 = vmatpush1.bf16.msra.mxu1 %v2012_v26  ;;  %2015 = vmatprep.subr.bf16.mxu0 %v2014_v30 }
   0xc   :  { %1795 = vmatmul.mubr.msk.f32.gmra.mrb[2].mxu0 %vm35_vm0, %v2160_v29  ;;  %2019 = vmatprep.subr.bf16.mxu1 %v2018_v33 }
   0xd   :  { %1803 = vmatmul.mubr.msk.f32.gmra.mrb[2].mxu1 %vm35_vm0, %v2160_v29  ;;  %124 = vmatprep.mubr.f32.mxu0 %v2059_v7 }
   0xe   :  { %218 = vmatprep.mubr.f32.mxu1 %v2059_v7  ;;  %445 = vperm.xlu0 %2033, %v25_v35  }
   0xf   :  { %10 = vsyncpa [#allocation3], 0  ;;  %v26_v37 = vld [vmem:[%s3513_s2 + $0x8] sm:$0xff]  ;;  %455 = vperm.xlu1 %2034, %v27_v36   ;;  %v28_v38 = vld [vmem:[%s3513_s2 + $0x18] sm:$0xff]  ;;  %vm496_vm1 = vcmask 556032   ;;  %vm930_vm12 = vcmask 73728  }
  0x10   :  { %1796 = vmatmul.mubr.msk.f32.gmra.mrb[4].mxu0 %vm35_vm0, %v2178_v34  ;;  %v2201_v39 = vld [vmem:[%s3512_s1 + $0x18] sm:$0xff]  ;;  %v1894_v40 = vld [vmem:[%s3511_s0 + $0x80] sm:$0xff]  ;;  %v1896_v41 = vld [vmem:[%s3511_s0 + $0x90] sm:$0xff] }
  0x11   :  { %1804 = vmatmul.mubr.msk.f32.gmra.mrb[4].mxu1 %vm35_vm0, %v2178_v34  ;;  %130 = vmatprep.mubr.f32.mxu0 %v2059_v7  ;;  %v1902_v42 = vld [vmem:[%s3511_s0 + $0xa0] sm:$0xff]  ;;  %v1904_v43 = vld [vmem:[%s3511_s0 + $0xb0] sm:$0xff]  ;;  %v1911_v44 = vld [vmem:[%s3511_s0 + $0xc8] sm:$0xff]  ;;  %v2016_v48 = vpack.c.bf16 %v1896_v41, %v1894_v40 }
  0x12   :  { %224 = vmatprep.mubr.f32.mxu1 %v2059_v7  ;;  %450 = vperm.xlu0 %2033, %v26_v37   ;;  %v1913_v45 = vld [vmem:[%s3511_s0 + $0xd8] sm:$0xff]  ;;  %v1919_v46 = vld [vmem:[%s3511_s0 + $0xe8] sm:$0xff]  ;;  %v2020_v49 = vpack.c.bf16 %v1904_v43, %v1902_v42  ;;  %v1910_v52 = vld [vmem:[%s3511_s0 + $0xc0] sm:$0xff] }
  0x13   :  { %460 = vperm.xlu1 %2034, %v28_v38   ;;  %v1921_v47 = vld [vmem:[%s3511_s0 + $0xf8] sm:$0xff]  ;;  %v2022_v50 = vpack.c.bf16 %v1913_v45, %v1911_v44  ;;  %v1912_v53 = vld [vmem:[%s3511_s0 + $0xd0] sm:$0xff]  ;;  %v1918_v54 = vld [vmem:[%s3511_s0 + $0xe0] sm:$0xff] }
  0x14   :  { %1797 = vmatmul.mubr.msk.f32.gmra.mrb[6].mxu0 %vm35_vm0, %v2201_v39  ;;  %v2026_v51 = vpack.c.bf16 %v1921_v47, %v1919_v46  ;;  %v1920_v55 = vld [vmem:[%s3511_s0 + $0xf0] sm:$0xff]  ;;  %v2024_v56 = vpack.c.bf16 %v1912_v53, %v1910_v52  ;;  %v2329_v35 = vld [vmem:[%s3514_s3 + $0x40] sm:$0xff]  ;;  %v2343_v40 = vld [vmem:[%s3514_s3 + $0x48] sm:$0xff] }
  0x15   :  { %1805 = vmatmul.mubr.msk.f32.gmra.mrb[6].mxu1 %vm35_vm0, %v2201_v39  ;;  %308 = vmatprep.mubr.f32.mxu0 %v2059_v7  ;;  %v2028_v57 = vpack.c.bf16 %v1920_v55, %v1918_v54  ;;  %v2334_v36 = vld [vmem:[%s3514_s3] sm:$0xff]  ;;  %v2348_v41 = vld [vmem:[%s3514_s3 + $0x8] sm:$0xff] }
  0x16   :  { %410 = vmatprep.mubr.f32.mxu1 %v2059_v7  ;;  %v2357_v46 = vld [vmem:[%s3514_s3 + $0x80] sm:$0xff]  ;;  %v2362_v47 = vld [vmem:[%s3514_s3 + $0x88] sm:$0xff] }
  0x18   :  { %1810 = vmatmul.mubr.msk.f32.vlgmr.msra.gmra.mrb[8].mxu0 %vm35_vm0, %v2121_v12 }
  0x19   :  { %1818 = vmatmul.mubr.msk.f32.vlgmr.msra.gmra.mrb[8].mxu1 %vm35_vm0, %v2121_v12  ;;  %314 = vmatprep.mubr.f32.mxu0 %v2059_v7 }
  0x1a   :  { %416 = vmatprep.mubr.f32.mxu1 %v2059_v7  ;;  %2017 = vmatpush1.bf16.msra.mxu0 %v2016_v48 }
  0x1b   :  { %2021 = vmatpush1.bf16.msra.mxu1 %v2020_v49  ;;  %2023 = vmatprep.subr.bf16.mxu0 %v2022_v50 }
  0x1c   :  { %1811 = vmatmul.mubr.msk.f32.gmra.mrb[10].mxu0 %vm35_vm0, %v2160_v29  ;;  %2027 = vmatprep.subr.bf16.mxu1 %v2026_v51 }
  0x1d   :  { %1819 = vmatmul.mubr.msk.f32.gmra.mrb[10].mxu1 %vm35_vm0, %v2160_v29  ;;  %320 = vmatprep.mubr.f32.mxu0 %v2059_v7 }
  0x1e   :  { %422 = vmatprep.mubr.f32.mxu1 %v2059_v7 }
  0x20   :  { %1812 = vmatmul.mubr.msk.f32.gmra.mrb[12].mxu0 %vm35_vm0, %v2178_v34 }
  0x21   :  { %1820 = vmatmul.mubr.msk.f32.gmra.mrb[12].mxu1 %vm35_vm0, %v2178_v34  ;;  %326 = vmatprep.mubr.f32.mxu0 %v2059_v7 }
  0x22   :  { %428 = vmatprep.mubr.f32.mxu1 %v2059_v7 }
  0x24   :  { %1813 = vmatmul.mubr.msk.f32.gmra.mrb[14].mxu0 %vm35_vm0, %v2201_v39 }
  0x25   :  { %1821 = vmatmul.mubr.msk.f32.gmra.mrb[14].mxu1 %vm35_vm0, %v2201_v39  ;;  %1001 = vmatprep.mubr.f32.mxu0 %v2059_v7 }
  0x26   :  { %1095 = vmatprep.mubr.f32.mxu1 %v2059_v7 }
  0x28   :  { %1898 = vmatmul.mubr.msk.f32.vlgmr.msra.gmra.mrb[16].mxu0 %vm35_vm0, %v2121_v12 }
  0x29   :  { %1906 = vmatmul.mubr.msk.f32.vlgmr.msra.gmra.mrb[16].mxu1 %vm35_vm0, %v2121_v12  ;;  %1007 = vmatprep.mubr.f32.mxu0 %v2059_v7 }
  0x2a   :  { %1101 = vmatprep.mubr.f32.mxu1 %v2059_v7  ;;  %2025 = vmatpush1.bf16.msra.mxu0 %v2024_v56 }
  0x2b   :  { %2029 = vmatpush1.bf16.msra.mxu1 %v2028_v57 }
  0x2c   :  { %1899 = vmatmul.mubr.msk.f32.gmra.mrb[18].mxu0 %vm35_vm0, %v2160_v29 }
  0x2d   :  { %1907 = vmatmul.mubr.msk.f32.gmra.mrb[18].mxu1 %vm35_vm0, %v2160_v29  ;;  %1013 = vmatprep.mubr.f32.mxu0 %v2059_v7 }
  0x2e   :  { %1107 = vmatprep.mubr.f32.mxu1 %v2059_v7 }
  0x30   :  { %1900 = vmatmul.mubr.msk.f32.gmra.mrb[20].mxu0 %vm35_vm0, %v2178_v34 }
  0x31   :  { %1908 = vmatmul.mubr.msk.f32.gmra.mrb[20].mxu1 %vm35_vm0, %v2178_v34  ;;  %1019 = vmatprep.mubr.f32.mxu0 %v2059_v7 }
  0x32   :  { %1113 = vmatprep.mubr.f32.mxu1 %v2059_v7 }
  0x34   :  { %1901 = vmatmul.mubr.msk.f32.gmra.mrb[22].mxu0 %vm35_vm0, %v2201_v39 }
  0x35   :  { %1909 = vmatmul.mubr.msk.f32.gmra.mrb[22].mxu1 %vm35_vm0, %v2201_v39  ;;  %1197 = vmatprep.mubr.f32.mxu0 %v2059_v7 }
  0x36   :  { %1299 = vmatprep.mubr.f32.mxu1 %v2059_v7 }
  0x38   :  { %1914 = vmatmul.mubr.msk.f32.vlgmr.msra.gmra.mrb[24].mxu0 %vm35_vm0, %v2121_v12 }
  0x39   :  { %1922 = vmatmul.mubr.msk.f32.vlgmr.msra.gmra.mrb[24].mxu1 %vm35_vm0, %v2121_v12  ;;  %1203 = vmatprep.mubr.f32.mxu0 %v2059_v7 }
  0x3a   :  { %1305 = vmatprep.mubr.f32.mxu1 %v2059_v7 }
  0x3c   :  { %1915 = vmatmul.mubr.msk.f32.gmra.mrb[26].mxu0 %vm35_vm0, %v2160_v29 }
  0x3d   :  { %1923 = vmatmul.mubr.msk.f32.gmra.mrb[26].mxu1 %vm35_vm0, %v2160_v29  ;;  %1209 = vmatprep.mubr.f32.mxu0 %v2059_v7 }
  0x3e   :  { %1311 = vmatprep.mubr.f32.mxu1 %v2059_v7 }
  0x40   :  { %1916 = vmatmul.mubr.msk.f32.gmra.mrb[28].mxu0 %vm35_vm0, %v2178_v34 }
  0x41   :  { %1924 = vmatmul.mubr.msk.f32.gmra.mrb[28].mxu1 %vm35_vm0, %v2178_v34  ;;  %1215 = vmatprep.mubr.f32.mxu0 %v2059_v7 }
  0x42   :  { %1317 = vmatprep.mubr.f32.mxu1 %v2059_v7 }
  0x44   :  { %1917 = vmatmul.mubr.msk.f32.gmra.mrb[30].mxu0 %vm35_vm0, %v2201_v39 }
  0x45   :  { %1925 = vmatmul.mubr.msk.f32.gmra.mrb[30].mxu1 %vm35_vm0, %v2201_v39 }
  0x8d   :  { %v2322_v23 = vpop.permute.xlu0 %445 }
  0x8e   :  { %v2338_v39 = vpop.permute.xlu1 %455 }
  0x91   :  { %v2352_v43 = vpop.permute.xlu0 %450 }
  0xdb   :  { %v114_v58 = vpop.f32.mrb[0].mxu0 }
  0xdc   :  { %v208_v59 = vpop.f32.mrb[0].mxu1  ;;  %v116_v60 = vpop.f32.mrb[1].mxu0 }
  0xdd   :  { %v231_v61 = vmax.f32 %v114_v58, %v208_v59  ;;  %v210_v62 = vpop.f32.mrb[1].mxu1 }
  0xde   :  { %v232_v63 = vmax.f32 %v116_v60, %v210_v62 }
  0xdf   :  { %v120_v0 = vpop.f32.mrb[2].mxu0 }
  0xe0   :  { %v214_v1 = vpop.f32.mrb[2].mxu1  ;;  %v122_v2 = vpop.f32.mrb[3].mxu0 }
  0xe1   :  { %v233_v3 = vmax.f32 %v120_v0, %v214_v1  ;;  %v216_v4 = vpop.f32.mrb[3].mxu1 }
  0xe2   :  { %v234_v5 = vmax.f32 %v122_v2, %v216_v4 }
  0xe3   :  { %v126_v6 = vpop.f32.mrb[4].mxu0 }
  0xe4   :  { %v220_v7 = vpop.f32.mrb[4].mxu1  ;;  %v128_v8 = vpop.f32.mrb[5].mxu0 }
  0xe5   :  { %v235_v9 = vmax.f32 %v126_v6, %v220_v7  ;;  %v222_v10 = vpop.f32.mrb[5].mxu1 }
  0xe6   :  { %v236_v11 = vmax.f32 %v128_v8, %v222_v10 }
  0xe7   :  { %v132_v12 = vpop.f32.mrb[6].mxu0 }
  0xe8   :  { %v226_v13 = vpop.f32.mrb[6].mxu1  ;;  %v2316_v14 = vpop.f32.mrb[7].mxu0 }
  0xe9   :  { %v237_v15 = vmax.f32 %v132_v12, %v226_v13  ;;  %v2318_v16 = vpop.f32.mrb[7].mxu1  ;;  %v2398_v12 = vld [vmem:[%s3514_s3 + $0xc0] sm:$0xff]  ;;  %v2403_v13 = vld [vmem:[%s3514_s3 + $0xc8] sm:$0xff] }
  0xea   :  { %v238_v17 = vmax.f32 %v2316_v14, %v2318_v16  ;;  %3566 = vst [vmem:[#allocation7_spill] sm:$0xff] %v2398_v12  ;;  %3567 = vst [vmem:[#allocation8_spill] sm:$0xff] %v2403_v13 }
  0xeb   :  { %v310_v18 = vpop.f32.mrb[8].mxu0 }
  0xec   :  { %v333_v19 = vmax.f32 %v231_v61, %v310_v18  ;;  %v312_v20 = vpop.f32.mrb[9].mxu0  ;;  %v412_v21 = vpop.f32.mrb[8].mxu1 }
  0xed   :  { %v334_v22 = vmax.f32 %v232_v63, %v312_v20  ;;  %v414_v24 = vpop.f32.mrb[9].mxu1  ;;  %v2383_v63 = vld [vmem:[%s3514_s3 + $0x180] sm:$0xff]  ;;  %v2409_v20 = vpop.permute.xlu1 %460 }
  0xee   :  { %v435_v25 = vmax.f32 %v333_v19, %v412_v21  ;;  %3564 = vst [vmem:[#allocation5_spill] sm:$0xff] %v2383_v63 }
  0xef   :  { %v436_v26 = vmax.f32 %v334_v22, %v414_v24  ;;  %v316_v27 = vpop.f32.mrb[10].mxu0  ;;  %v2417_v24 = vld [vmem:[%s3514_s3 + $0x50] sm:$0xff] }
  0xf0   :  { %v463_v28 = vadd.f32 %v2322_v23, %v435_v25  ;;  %v335_v29 = vmax.f32 %v233_v3, %v316_v27  ;;  %v318_v30 = vpop.f32.mrb[11].mxu0  ;;  %v418_v31 = vpop.f32.mrb[10].mxu1  ;;  %3568 = vst [vmem:[#allocation9_spill] sm:$0xff] %v2417_v24  ;;  %v2422_v25 = vld [vmem:[%s3514_s3 + $0x58] sm:$0xff] }
  0xf1   :  { %v464_v32 = vadd.f32 %v2322_v23, %v436_v26  ;;  %v336_v33 = vmax.f32 %v234_v5, %v318_v30  ;;  %v420_v34 = vpop.f32.mrb[11].mxu1  ;;  %v2392_v5 = vld [vmem:[%s3514_s3 + $0x188] sm:$0xff]  ;;  %3569 = vst [vmem:[#allocation10_spill] sm:$0xff] %v2422_v25 }
  0xf2   :  { %v2336_v37 = vmax.f32 %v463_v28, 0.0  ;;  %v437_v38 = vmax.f32 %v335_v29, %v418_v31  ;;  %3565 = vst [vmem:[#allocation6_spill] sm:$0xff] %v2392_v5 }
  0xf3   :  { %v2350_v42 = vmax.f32 %v464_v32, 0.0  ;;  %v438_v44 = vmax.f32 %v336_v33, %v420_v34  ;;  %v322_v45 = vpop.f32.mrb[12].mxu0 }
  0xf4   :  { %v465_v48 = vadd.f32 %v2352_v43, %v437_v38  ;;  %v337_v49 = vmax.f32 %v235_v9, %v322_v45  ;;  %v324_v50 = vpop.f32.mrb[13].mxu0  ;;  %v424_v51 = vpop.f32.mrb[12].mxu1  ;;  %v534_v52 = vmul.f32 %v2329_v35, %v2336_v37  ;;  %v488_v53 = vmul.f32 %v2334_v36, %v2336_v37 }
  0xf5   :  { %v466_v54 = vadd.f32 %v2352_v43, %v438_v44  ;;  %v338_v55 = vmax.f32 %v236_v11, %v324_v50  ;;  %v426_v56 = vpop.f32.mrb[13].mxu1  ;;  %v535_v57 = vmul.f32 %v2343_v40, %v2350_v42  ;;  %v489_v58 = vmul.f32 %v2348_v41, %v2350_v42  ;;  %v2459_v50 = vld [vmem:[%s3514_s3 + $0x140] sm:$0xff] }
  0xf6   :  { %v2374_v59 = vmax.f32 %v465_v48, 0.0  ;;  %v439_v60 = vmax.f32 %v337_v49, %v424_v51  ;;  %v579_v61 = vmul.f32 %v2357_v46, %v2336_v37  ;;  %v580_v62 = vmul.f32 %v2362_v47, %v2350_v42  ;;  %v2449_v48 = vld [vmem:[%s3514_s3 + $0x100] sm:$0xff]  ;;  %v2454_v49 = vld [vmem:[%s3514_s3 + $0x108] sm:$0xff]  ;;  %3574 = vst [vmem:[#allocation15_spill] sm:$0xff] %v2459_v50 }
  0xf7   :  { %v2385_v0 = vmax.f32 %v466_v54, 0.0  ;;  %v440_v1 = vmax.f32 %v338_v55, %v426_v56  ;;  %v328_v2 = vpop.f32.mrb[14].mxu0  ;;  %v542_v3 = vsel %vm496_vm1, %v535_v57, 0.0  ;;  %v497_v4 = vsel %vm496_vm1, %v489_v58, 0.0  ;;  %3572 = vst [vmem:[#allocation13_spill] sm:$0xff] %v2449_v48  ;;  %3573 = vst [vmem:[#allocation14_spill] sm:$0xff] %v2454_v49 }
  0xf8   :  { %v467_v6 = vadd.f32 %v2338_v39, %v439_v60  ;;  %v339_v7 = vmax.f32 %v237_v15, %v328_v2  ;;  %v330_v8 = vpop.f32.mrb[15].mxu0  ;;  %v430_v9 = vpop.f32.mrb[14].mxu1  ;;  %v543_v10 = vadd.f32 %v542_v3, %v534_v52  ;;  %v498_v11 = vadd.f32 %v497_v4, %v488_v53  ;;  %v2470_v56 = vld [vmem:[%s3514_s3 + $0x90] sm:$0xff]  ;;  %v2475_v57 = vld [vmem:[%s3514_s3 + $0x98] sm:$0xff]  ;;  %v2480_v58 = vld [vmem:[%s3514_s3 + $0x148] sm:$0xff] }
  0xf9   :  { %v468_v18 = vadd.f32 %v2338_v39, %v440_v1  ;;  %v340_v15 = vmax.f32 %v238_v17, %v330_v8  ;;  %v432_v19 = vpop.f32.mrb[15].mxu1  ;;  %v587_v21 = vsel %vm496_vm1, %v580_v62, 0.0  ;;  %v759_v22 = vmul.f32 %v2383_v63, %v2336_v37  ;;  %3575 = vst [vmem:[#allocation16_spill] sm:$0xff] %v2470_v56  ;;  %3576 = vst [vmem:[#allocation17_spill] sm:$0xff] %v2475_v57  ;;  %v2490_v2 = vld [vmem:[%s3514_s3 + $0xd0] sm:$0xff]  ;;  %v2495_v3 = vld [vmem:[%s3514_s3 + $0xd8] sm:$0xff] }
  0xfa   :  { %v2424_v14 = vmax.f32 %v467_v6, 0.0  ;;  %v441_v16 = vmax.f32 %v339_v7, %v430_v9  ;;  %544 = vadd.xlane.f32.xlu1 %v543_v10  ;;  %499 = vadd.xlane.f32.xlu0 %v498_v11  ;;  %v588_v17 = vadd.f32 %v587_v21, %v579_v61  ;;  %v760_v26 = vmul.f32 %v2392_v5, %v2350_v42  ;;  %v2603_v63 = vld [vmem:[%s3514_s3 + $0x248] sm:$0xff] }
  0xfb   :  { %v2428_v27 = vmax.f32 %v468_v18, 0.0  ;;  %v442_v28 = vmax.f32 %v340_v15, %v432_v19  ;;  %v624_v29 = vmul.f32 %v2398_v12, %v2336_v37  ;;  %v625_v30 = vmul.f32 %v2403_v13, %v2350_v42  ;;  %v2434_v31 = vpop.f32.mrb[16].mxu0  ;;  %3577 = vst [vmem:[#allocation18_spill] sm:$0xff] %v2480_v58  ;;  %3578 = vst [vmem:[#allocation19_spill] sm:$0xff] %v2490_v2 }
  0xfc   :  { %3570 = vst [vmem:[#allocation11_spill] sm:$0xff] %v2424_v14  ;;  %v469_v32 = vadd.f32 %v2409_v20, %v441_v16  ;;  %v767_v33 = vsel %vm496_vm1, %v760_v26, 0.0  ;;  %v536_v34 = vmul.f32 %v2417_v24, %v2374_v59  ;;  %v537_v38 = vmul.f32 %v2422_v25, %v2385_v0  ;;  %v2442_v44 = vpop.f32.mrb[17].mxu0  ;;  %v2444_v45 = vpop.f32.mrb[16].mxu1  ;;  %3579 = vst [vmem:[#allocation20_spill] sm:$0xff] %v2495_v3  ;;  %v2717_v25 = vld [vmem:[%s3514_s3 + $0x68] sm:$0xff] }
  0xfd   :  { %3571 = vst [vmem:[#allocation12_spill] sm:$0xff] %v2428_v27  ;;  %v470_v51 = vadd.f32 %v2409_v20, %v442_v28  ;;  %v768_v52 = vadd.f32 %v767_v33, %v759_v22  ;;  %v632_v53 = vsel %vm496_vm1, %v625_v30, 0.0  ;;  %v2465_v55 = vpop.f32.mrb[17].mxu1  ;;  %v669_v8 = vmul.f32 %v2449_v48, %v2336_v37  ;;  %v2520_v22 = vld [vmem:[%s3514_s3 + $0x1c0] sm:$0xff]  ;;  %v2534_v30 = vld [vmem:[%s3514_s3 + $0x1c8] sm:$0xff]  ;;  %v2544_v33 = vld [vmem:[%s3514_s3 + $0x118] sm:$0xff] }
  0xfe   :  { %v2482_v60 = vmax.f32 %v469_v32, 0.0  ;;  %589 = vadd.xlane.f32.xlu1 %v588_v17  ;;  %v633_v61 = vadd.f32 %v632_v53, %v624_v29  ;;  %v546_v62 = vsel %vm496_vm1, %v537_v38, 0.0  ;;  %v670_v9 = vmul.f32 %v2454_v49, %v2350_v42  ;;  %v2539_v32 = vld [vmem:[%s3514_s3 + $0x110] sm:$0xff]  ;;  %3581 = vst [vmem:[#allocation22_spill] sm:$0xff] %v2544_v33  ;;  %v2553_v53 = vld [vmem:[%s3514_s3 + $0x200] sm:$0xff] }
  0xff   :  { %v2497_v4 = vmax.f32 %v470_v51, 0.0  ;;  %769 = vadd.xlane.f32.xlu0 %v768_v52  ;;  %v547_v6 = vadd.f32 %v546_v62, %v536_v34  ;;  %v2499_v7 = vpop.f32.mrb[18].mxu0  ;;  %v581_v10 = vmul.f32 %v2470_v56, %v2374_v59  ;;  %v582_v11 = vmul.f32 %v2475_v57, %v2385_v0  ;;  %3580 = vst [vmem:[#allocation21_spill] sm:$0xff] %v2539_v32  ;;  %v2558_v62 = vld [vmem:[%s3514_s3 + $0x208] sm:$0xff]  ;;  %v2573_v51 = vld [vmem:[%s3514_s3 + $0x158] sm:$0xff]  ;;  %v2639_v49 = vld [vmem:[%s3514_s3 + $0x10] sm:$0xff] }
 0x100   :  { %v2509_v18 = vpop.f32.mrb[19].mxu0  ;;  %v2511_v15 = vpop.f32.mrb[18].mxu1  ;;  %v714_v19 = vmul.f32 %v2459_v50, %v2336_v37  ;;  %v715_v21 = vmul.f32 %v2480_v58, %v2350_v42  ;;  %v677_v16 = vsel %vm496_vm1, %v670_v9, 0.0  ;;  %v626_v28 = vmul.f32 %v2490_v2, %v2374_v59  ;;  %3583 = vst [vmem:[#allocation24_spill] sm:$0xff] %v2573_v51  ;;  %v2619_v50 = vld [vmem:[%s3514_s3 + $0x1d8] sm:$0xff]  ;;  %3588 = vst [vmem:[#allocation29_spill] sm:$0xff] %v2639_v49 }
 0x101   :  { %v2525_v26 = vpop.f32.mrb[19].mxu1  ;;  %v627_v29 = vmul.f32 %v2495_v3, %v2385_v0  ;;  %v678_v34 = vadd.f32 %v677_v16, %v669_v8  ;;  %v591_v38 = vsel %vm496_vm1, %v582_v11, 0.0  ;;  %v804_v16 = vmul.f32 %v2520_v22, %v2336_v37  ;;  %3585 = vst [vmem:[#allocation26_spill] sm:$0xff] %v2619_v50  ;;  %v2624_v3 = vld [vmem:[%s3514_s3 + $0x210] sm:$0xff]  ;;  %v2634_v2 = vld [vmem:[%s3514_s3 + $0x218] sm:$0xff] }
 0x102   :  { %634 = vadd.xlane.f32.xlu1 %v633_v61  ;;  %v722_v52 = vsel %vm496_vm1, %v715_v21, 0.0  ;;  %v2563_v61 = vld [vmem:[%s3514_s3 + $0x150] sm:$0xff]  ;;  %v592_v8 = vadd.f32 %v591_v38, %v581_v10  ;;  %v671_v10 = vmul.f32 %v2539_v32, %v2374_v59  ;;  %3586 = vst [vmem:[#allocation27_spill] sm:$0xff] %v2624_v3  ;;  %3587 = vst [vmem:[#allocation28_spill] sm:$0xff] %v2634_v2  ;;  %v2675_v57 = vld [vmem:[%s3514_s3 + $0x258] sm:$0xff] }
 0x103   :  { %3582 = vst [vmem:[#allocation23_spill] sm:$0xff] %v2563_v61  ;;  %548 = vadd.xlane.f32.xlu0 %v547_v6  ;;  %v2565_v9 = vpop.f32.mrb[20].mxu0  ;;  %v723_v11 = vadd.f32 %v722_v52, %v714_v19  ;;  %v636_v21 = vsel %vm496_vm1, %v627_v29, 0.0  ;;  %v805_v6 = vmul.f32 %v2534_v30, %v2350_v42  ;;  %v672_v19 = vmul.f32 %v2544_v33, %v2385_v0  ;;  %v2588_v29 = vld [vmem:[%s3514_s3 + $0x240] sm:$0xff]  ;;  %v2608_v38 = vld [vmem:[%s3514_s3 + $0x1d0] sm:$0xff] }
 0x104   :  { %v2575_v17 = vpop.f32.mrb[21].mxu0  ;;  %v2577_v1 = vpop.f32.mrb[20].mxu1  ;;  %v637_v54 = vadd.f32 %v636_v21, %v626_v28  ;;  %v849_v28 = vmul.f32 %v2553_v53, %v2336_v37  ;;  %v850_v21 = vmul.f32 %v2558_v62, %v2350_v42  ;;  %v716_v5 = vmul.f32 %v2563_v61, %v2374_v59  ;;  %3584 = vst [vmem:[#allocation25_spill] sm:$0xff] %v2608_v38 }
 0x105   :  { %v2592_v52 = vpop.f32.mrb[21].mxu1  ;;  %v812_v32 = vsel %vm496_vm1, %v805_v6, 0.0  ;;  %v681_v58 = vsel %vm496_vm1, %v672_v19, 0.0  ;;  %v717_v61 = vmul.f32 %v2573_v51, %v2385_v0  ;;  %v894_v51 = vmul.f32 %v2588_v29, %v2336_v37  ;;  %3591 = vst [vmem:[#allocation32_spill] sm:$0xff] %v2675_v57 }
 0x106   :  { %679 = vadd.xlane.f32.xlu1 %v678_v34  ;;  %v813_v33 = vadd.f32 %v812_v32, %v804_v16  ;;  %v682_v6 = vadd.f32 %v681_v58, %v671_v10  ;;  %v857_v19 = vsel %vm496_vm1, %v850_v21, 0.0  ;;  %v895_v37 = vmul.f32 %v2603_v63, %v2350_v42  ;;  %v2655_v10 = vld [vmem:[%s3514_s3 + $0x18] sm:$0xff]  ;;  %v2660_v21 = vld [vmem:[%s3514_s3 + $0x250] sm:$0xff] }
 0x107   :  { %593 = vadd.xlane.f32.xlu0 %v592_v8  ;;  %v2626_v34 = vpop.f32.mrb[22].mxu0  ;;  %v2645_v58 = vadd.f32 %v857_v19, %v849_v28  ;;  %v726_v32 = vsel %vm496_vm1, %v717_v61, 0.0  ;;  %v806_v16 = vmul.f32 %v2608_v38, %v2374_v59  ;;  %3589 = vst [vmem:[#allocation30_spill] sm:$0xff] %v2655_v10  ;;  %3590 = vst [vmem:[#allocation31_spill] sm:$0xff] %v2660_v21 }
 0x108   :  { %v2641_v8 = vpop.f32.mrb[23].mxu0  ;;  %v2643_v48 = vpop.f32.mrb[22].mxu1  ;;  %v2666_v19 = vadd.f32 %v726_v32, %v716_v5  ;;  %v807_v42 = vmul.f32 %v2619_v50, %v2385_v0  ;;  %v851_v38 = vmul.f32 %v2624_v3, %v2374_v59  ;;  %v902_v28 = vsel %vm496_vm1, %v895_v37, 0.0  ;;  %v2687_v3 = vld [vmem:[%s3514_s3 + $0x190] sm:$0xff] }
 0x109   :  { %v2664_v61 = vpop.f32.mrb[23].mxu1  ;;  %v852_v5 = vmul.f32 %v2634_v2, %v2385_v0  ;;  %v490_v32 = vmul.f32 %v2639_v49, %v2374_v59  ;;  %v2689_v13 = vadd.f32 %v902_v28, %v894_v51  ;;  %v491_v37 = vmul.f32 %v2655_v10, %v2385_v0  ;;  %v2699_v2 = vld [vmem:[%s3514_s3 + $0x198] sm:$0xff] }
 0x10a   :  { %724 = vadd.xlane.f32.xlu1 %v723_v11  ;;  %v816_v11 = vsel %vm496_vm1, %v807_v42, 0.0  ;;  %v896_v56 = vmul.f32 %v2660_v21, %v2374_v59  ;;  %v3592_v49 = vmax.f32 %v2434_v31, %v2444_v45  ;;  %v897_v10 = vmul.f32 %v2675_v57, %v2385_v0  ;;  %v2712_v21 = vld [vmem:[%s3514_s3 + $0x60] sm:$0xff] }
 0x10b   :  { %638 = vadd.xlane.f32.xlu0 %v637_v54  ;;  %v1199_v50 = vpop.f32.mrb[24].mxu0  ;;  %v2704_v28 = vadd.f32 %v816_v11, %v806_v16  ;;  %v861_v42 = vsel %vm496_vm1, %v852_v5, 0.0  ;;  %v3593_v31 = vmax.f32 %v2442_v44, %v2465_v55  ;;  %v501_v16 = vsel %vm496_vm1, %v491_v37, 0.0  ;;  %v2730_v11 = vld [vmem:[%s3514_s3 + $0x20] sm:$0xff] }
 0x10c   :  { %v1222_v54 = vmax.f32 %v3592_v49, %v1199_v50  ;;  %v1201_v12 = vpop.f32.mrb[25].mxu0  ;;  %v1301_v51 = vpop.f32.mrb[24].mxu1  ;;  %v2722_v50 = vadd.f32 %v861_v42, %v851_v38  ;;  %v761_v5 = vmul.f32 %v2687_v3, %v2374_v59  ;;  %v2732_v24 = vadd.f32 %v501_v16, %v490_v32 }
 0x10d   :  { %v1223_v45 = vmax.f32 %v3593_v31, %v1201_v12  ;;  %v1303_v49 = vpop.f32.mrb[25].mxu1  ;;  %v906_v44 = vsel %vm496_vm1, %v897_v10, 0.0  ;;  %v762_v12 = vmul.f32 %v2699_v2, %v2385_v0  ;;  %v538_v59 = vmul.f32 %v2712_v21, %v2424_v14  ;;  %v2758_v31 = vld [vmem:[%s3514_s3 + $0xa0] sm:$0xff] }
 0x10e   :  { %v1324_v57 = vmax.f32 %v1222_v54, %v1301_v51  ;;  %814 = vadd.xlane.f32.xlu1 %v813_v33  ;;  %v2737_v37 = vadd.f32 %v906_v44, %v896_v56  ;;  %v539_v42 = vmul.f32 %v2717_v25, %v2428_v27  ;;  %v2746_v33 = vld [vmem:[%s3514_s3 + $0x28] sm:$0xff]  ;;  %v3594_v0 = vmax.f32 %v2499_v7, %v2511_v15 }
 0x10f   :  { %v1325_v55 = vmax.f32 %v1223_v45, %v1303_v49  ;;  %683 = vadd.xlane.f32.xlu0 %v682_v6  ;;  %v1205_v38 = vpop.f32.mrb[26].mxu0  ;;  %v771_v54 = vsel %vm496_vm1, %v762_v12, 0.0  ;;  %v492_v51 = vmul.f32 %v2730_v11, %v2424_v14  ;;  %v3595_v15 = vmax.f32 %v2509_v18, %v2525_v26  ;;  %v2775_v12 = vld [vmem:[%s3514_s3 + $0x1a0] sm:$0xff] }
 0x110   :  { %v1332_v10 = vadd.f32 %v1324_v57, %v2322_v23  ;;  %v1224_v6 = vmax.f32 %v3594_v0, %v1205_v38  ;;  %v1207_v32 = vpop.f32.mrb[27].mxu0  ;;  %v1307_v56 = vpop.f32.mrb[26].mxu1  ;;  %v2763_v57 = vld [vmem:[%s3514_s3 + $0xa8] sm:$0xff]  ;;  %v2769_v16 = vadd.f32 %v771_v54, %v761_v5  ;;  %v550_v44 = vsel %vm496_vm1, %v539_v42, 0.0  ;;  %3596 = vst [vmem:[#allocation33_spill] sm:$0xff] %v2775_v12 }
 0x111   :  { %v1333_v7 = vadd.f32 %v1325_v55, %v2322_v23  ;;  %v1225_v45 = vmax.f32 %v3595_v15, %v1207_v32  ;;  %v1309_v49 = vpop.f32.mrb[27].mxu1  ;;  %v2780_v23 = vadd.f32 %v550_v44, %v538_v59  ;;  %v493_v18 = vmul.f32 %v2746_v33, %v2428_v27  ;;  %v2806_v15 = vld [vmem:[%s3514_s3 + $0xe0] sm:$0xff] }
 0x112   :  { %v2777_v38 = vmax.f32 %v1332_v10, 0.0  ;;  %v1326_v0 = vmax.f32 %v1224_v6, %v1307_v56  ;;  %859 = vadd.xlane.f32.xlu1 %v2645_v58  ;;  %v583_v42 = vmul.f32 %v2758_v31, %v2424_v14  ;;  %v584_v10 = vmul.f32 %v2763_v57, %v2428_v27  ;;  %v2794_v58 = vld [vmem:[%s3514_s3 + $0x1a8] sm:$0xff] }
 0x113   :  { %v2784_v26 = vmax.f32 %v1333_v7, 0.0  ;;  %v1327_v5 = vmax.f32 %v1225_v45, %v1309_v49  ;;  %728 = vadd.xlane.f32.xlu0 %v2666_v19  ;;  %v1211_v55 = vpop.f32.mrb[28].mxu0  ;;  %v3597_v6 = vmax.f32 %v2565_v9, %v2577_v1  ;;  %v505_v54 = vsel %vm496_vm1, %v493_v18, 0.0  ;;  %v2811_v45 = vld [vmem:[%s3514_s3 + $0xe8] sm:$0xff] }
 0x114   :  { %v1334_v59 = vadd.f32 %v1326_v0, %v2352_v43  ;;  %v1213_v56 = vpop.f32.mrb[29].mxu0  ;;  %v1313_v19 = vpop.f32.mrb[28].mxu1  ;;  %v763_v7 = vmul.f32 %v2775_v12, %v2424_v14  ;;  %v3598_v9 = vmax.f32 %v2575_v17, %v2592_v52  ;;  %v2817_v0 = vadd.f32 %v505_v54, %v492_v51 }
 0x115   :  { %v1226_v32 = vmax.f32 %v3597_v6, %v1211_v55  ;;  %v1335_v1 = vadd.f32 %v1327_v5, %v2352_v43  ;;  %v1315_v44 = vpop.f32.mrb[29].mxu1  ;;  %v595_v18 = vsel %vm496_vm1, %v584_v10, 0.0  ;;  %v2823_v55 = vld [vmem:[%s3514_s3 + $0x1e0] sm:$0xff]  ;;  %v764_v17 = vmul.f32 %v2794_v58, %v2428_v27 }
 0x116   :  { %v1227_v49 = vmax.f32 %v3598_v9, %v1213_v56  ;;  %v2825_v6 = vmax.f32 %v1334_v59, 0.0  ;;  %904 = vadd.xlane.f32.xlu1 %v2689_v13  ;;  %v2828_v43 = vadd.f32 %v595_v18, %v583_v42  ;;  %v628_v10 = vmul.f32 %v2806_v15, %v2424_v14  ;;  %v2842_v13 = vld [vmem:[%s3514_s3 + $0x1e8] sm:$0xff]  ;;  %v2854_v9 = vld [vmem:[%s3514_s3 + $0x120] sm:$0xff] }
 0x117   :  { %v1328_v12 = vmax.f32 %v1226_v32, %v1313_v19  ;;  %v2832_v52 = vmax.f32 %v1335_v1, 0.0  ;;  %818 = vadd.xlane.f32.xlu0 %v2704_v28  ;;  %v1217_v5 = vpop.f32.mrb[30].mxu0  ;;  %v629_v59 = vmul.f32 %v2811_v45, %v2428_v27  ;;  %v3599_v32 = vmax.f32 %v2626_v34, %v2643_v48 }
 0x118   :  { %v1329_v51 = vmax.f32 %v1227_v49, %v1315_v44  ;;  %v1219_v19 = vpop.f32.mrb[31].mxu0  ;;  %v1319_v28 = vpop.f32.mrb[30].mxu1  ;;  %v775_v54 = vsel %vm496_vm1, %v764_v17, 0.0  ;;  %v808_v1 = vmul.f32 %v2823_v55, %v2424_v14  ;;  %v3600_v34 = vmax.f32 %v2641_v8, %v2664_v61 }
 0x119   :  { %v1336_v42 = vadd.f32 %v1328_v12, %v2338_v39  ;;  %v1228_v56 = vmax.f32 %v3599_v32, %v1217_v5  ;;  %v2859_v12 = vld [vmem:[%s3514_s3 + $0x128] sm:$0xff]  ;;  %v1321_v44 = vpop.f32.mrb[31].mxu1  ;;  %v2865_v18 = vadd.f32 %v775_v54, %v763_v7  ;;  %v640_v17 = vsel %vm496_vm1, %v629_v59, 0.0  ;;  %v2871_v5 = vld [vmem:[%s3514_s3 + $0x220] sm:$0xff] }
 0x11a   :  { %v1337_v48 = vadd.f32 %v1329_v51, %v2338_v39  ;;  %v1229_v49 = vmax.f32 %v3600_v34, %v1219_v19  ;;  %v2876_v32 = vld [vmem:[%s3514_s3 + $0x228] sm:$0xff]  ;;  %503 = vadd.xlane.f32.xlu1 %v2732_v24  ;;  %v2881_v8 = vadd.f32 %v640_v17, %v628_v10  ;;  %v809_v61 = vmul.f32 %v2842_v13, %v2428_v27  ;;  %v2888_v7 = vld [vmem:[%s3514_s3 + $0x160] sm:$0xff]  ;;  %v2916_v34 = vld [vmem:[%s3514_s3 + $0x38] sm:$0xff] }
 0x11b   :  { %3601 = vst [vmem:[#allocation34_spill] sm:$0xff] %v2876_v32  ;;  %v2878_v39 = vmax.f32 %v1336_v42, 0.0  ;;  %v1330_v51 = vmax.f32 %v1228_v56, %v1319_v28  ;;  %3602 = vst [vmem:[#allocation35_spill] sm:$0xff] %v2888_v7  ;;  %863 = vadd.xlane.f32.xlu0 %v2722_v50  ;;  %v673_v42 = vmul.f32 %v2854_v9, %v2424_v14  ;;  %v2900_v10 = vld [vmem:[%s3514_s3 + $0x168] sm:$0xff] }
 0x11c   :  { %v2890_v59 = vmax.f32 %v1337_v48, 0.0  ;;  %v1331_v19 = vmax.f32 %v1229_v49, %v1321_v44  ;;  %v674_v24 = vmul.f32 %v2859_v12, %v2428_v27  ;;  %3603 = vst [vmem:[#allocation36_spill] sm:$0xff] %v2900_v10  ;;  %v820_v28 = vsel %vm496_vm1, %v809_v61, 0.0  ;;  %v2911_v48 = vld [vmem:[%s3514_s3 + $0x30] sm:$0xff]  ;;  %3605 = vst [vmem:[#allocation38_spill] sm:$0xff] %v2916_v34 }
 0x11d   :  { %v1338_v56 = vadd.f32 %v1330_v51, %v2409_v20  ;;  %v853_v54 = vmul.f32 %v2871_v5, %v2424_v14  ;;  %v854_v50 = vmul.f32 %v2876_v32, %v2428_v27  ;;  %3604 = vst [vmem:[#allocation37_spill] sm:$0xff] %v2911_v48  ;;  %v2919_v44 = vadd.f32 %v820_v28, %v808_v1  ;;  %v2927_v61 = vld [vmem:[%s3514_s3 + $0x1b0] sm:$0xff]  ;;  %v2932_v32 = vld [vmem:[%s3514_s3 + $0x1b8] sm:$0xff] }
 0x11e   :  { %v1339_v49 = vadd.f32 %v1331_v19, %v2409_v20  ;;  %v685_v17 = vsel %vm496_vm1, %v674_v24, 0.0  ;;  %v718_v51 = vmul.f32 %v2888_v7, %v2424_v14  ;;  %3606 = vst [vmem:[#allocation39_spill] sm:$0xff] %v2927_v61  ;;  %3607 = vst [vmem:[#allocation40_spill] sm:$0xff] %v2932_v32  ;;  %v2937_v20 = vld [vmem:[%s3514_s3 + $0x70] sm:$0xff]  ;;  %773 = vadd.xlane.f32.xlu1 %v2769_v16  ;;  %v2950_v14 = vld [vmem:[%s3514_s3 + $0x78] sm:$0xff] }
 0x11f   :  { %3608 = vst [vmem:[#allocation41_spill] sm:$0xff] %v2937_v20  ;;  %v2939_v1 = vmax.f32 %v1338_v56, 0.0  ;;  %v2942_v19 = vadd.f32 %v685_v17, %v673_v42  ;;  %v865_v24 = vsel %vm496_vm1, %v854_v50, 0.0  ;;  %v719_v28 = vmul.f32 %v2900_v10, %v2428_v27  ;;  %3610 = vst [vmem:[#allocation43_spill] sm:$0xff] %v2950_v14  ;;  %v2955_v7 = vld [vmem:[%s3514_s3 + $0x1f0] sm:$0xff]  ;;  %908 = vadd.xlane.f32.xlu0 %v2737_v37  ;;  %v2969_v17 = vld [vmem:[%s3514_s3 + $0x1f8] sm:$0xff] }
 0x120   :  { %3611 = vst [vmem:[#allocation44_spill] sm:$0xff] %v2955_v7  ;;  %v2957_v56 = vmax.f32 %v1339_v49, 0.0  ;;  %v2960_v16 = vadd.f32 %v865_v24, %v853_v54  ;;  %v494_v42 = vmul.f32 %v2911_v48, %v2482_v60  ;;  %v495_v50 = vmul.f32 %v2916_v34, %v2497_v4  ;;  %3613 = vst [vmem:[#allocation46_spill] sm:$0xff] %v2969_v17  ;;  %v2974_v49 = vld [vmem:[%s3514_s3 + $0xb0] sm:$0xff] }
 0x121   :  { %3609 = vst [vmem:[#allocation42_spill] sm:$0xff] %v2939_v1  ;;  %3614 = vst [vmem:[#allocation47_spill] sm:$0xff] %v2974_v49  ;;  %v730_v37 = vsel %vm496_vm1, %v719_v28, 0.0  ;;  %v765_v54 = vmul.f32 %v2927_v61, %v2482_v60  ;;  %v766_v24 = vmul.f32 %v2932_v32, %v2497_v4  ;;  %v540_v27 = vmul.f32 %v2937_v20, %v2482_v60  ;;  %v2991_v34 = vld [vmem:[%s3514_s3 + $0x230] sm:$0xff]  ;;  %v3003_v1 = vld [vmem:[%s3514_s3 + $0x238] sm:$0xff] }
 0x122   :  { %3612 = vst [vmem:[#allocation45_spill] sm:$0xff] %v2957_v56  ;;  %v2986_v56 = vld [vmem:[%s3514_s3 + $0xb8] sm:$0xff]  ;;  %3615 = vst [vmem:[#allocation48_spill] sm:$0xff] %v2991_v34  ;;  %v2993_v28 = vadd.f32 %v730_v37, %v718_v51  ;;  %v509_v61 = vsel %vm496_vm1, %v495_v50, 0.0  ;;  %v541_v32 = vmul.f32 %v2950_v14, %v2497_v4  ;;  %v810_v20 = vmul.f32 %v2955_v7, %v2482_v60  ;;  %v3008_v48 = vld [vmem:[%s3514_s3 + $0xf0] sm:$0xff] }
 0x123   :  { %3616 = vst [vmem:[#allocation49_spill] sm:$0xff] %v3003_v1  ;;  %552 = vadd.xlane.f32.xlu1 %v2780_v23  ;;  %v3011_v51 = vadd.f32 %v509_v61, %v494_v42  ;;  %v779_v50 = vsel %vm496_vm1, %v766_v24, 0.0  ;;  %v811_v37 = vmul.f32 %v2969_v17, %v2497_v4  ;;  %v585_v7 = vmul.f32 %v2974_v49, %v2482_v60  ;;  %v3021_v14 = vld [vmem:[%s3514_s3 + $0xf8] sm:$0xff]  ;;  %v3034_v24 = vld [vmem:[%s3514_s3 + $0x130] sm:$0xff] }
 0x124   :  { %3617 = vst [vmem:[#allocation50_spill] sm:$0xff] %v3021_v14  ;;  %507 = vadd.xlane.f32.xlu0 %v2817_v0  ;;  %v3024_v10 = vadd.f32 %v779_v50, %v765_v54  ;;  %v554_v23 = vsel %vm496_vm1, %v541_v32, 0.0  ;;  %v586_v61 = vmul.f32 %v2986_v56, %v2497_v4  ;;  %v855_v42 = vmul.f32 %v2991_v34, %v2482_v60  ;;  %v3046_v54 = vld [vmem:[%s3514_s3 + $0x138] sm:$0xff] }
 0x125   :  { %3618 = vst [vmem:[#allocation51_spill] sm:$0xff] %v3034_v24  ;;  %v3036_v17 = vadd.f32 %v554_v23, %v540_v27  ;;  %v824_v49 = vsel %vm496_vm1, %v811_v37, 0.0  ;;  %v856_v0 = vmul.f32 %v3003_v1, %v2497_v4  ;;  %v630_v32 = vmul.f32 %v3008_v48, %v2482_v60  ;;  %v3058_v23 = vld [vmem:[%s3514_s3 + $0x170] sm:$0xff] }
 0x126   :  { %v3048_v50 = vadd.f32 %v824_v49, %v810_v20  ;;  %v599_v34 = vsel %vm496_vm1, %v586_v61, 0.0  ;;  %v631_v27 = vmul.f32 %v3021_v14, %v2497_v4  ;;  %v1357_v37 = vmul.f32 %v2777_v38, %v2334_v36  ;;  %v3071_v36 = vld [vmem:[%s3514_s3 + $0x178] sm:$0xff] }
 0x127   :  { %597 = vadd.xlane.f32.xlu1 %v2828_v43  ;;  %v3061_v1 = vadd.f32 %v599_v34, %v585_v7  ;;  %v869_v20 = vsel %vm496_vm1, %v856_v0, 0.0  ;;  %v1358_v49 = vmul.f32 %v2784_v26, %v2348_v41  ;;  %v675_v61 = vmul.f32 %v3034_v24, %v2482_v60 }
 0x128   :  { %777 = vadd.xlane.f32.xlu0 %v2865_v18  ;;  %v3074_v14 = vadd.f32 %v869_v20, %v855_v42  ;;  %v644_v43 = vsel %vm496_vm1, %v631_v27, 0.0  ;;  %v676_v7 = vmul.f32 %v3046_v54, %v2497_v4  ;;  %v1658_v41 = vmul.f32 %v2520_v22, %v2777_v38 }
 0x129   :  { %v3081_v34 = vadd.f32 %v644_v43, %v630_v32  ;;  %v1365_v0 = vsel %vm496_vm1, %v1358_v49, 0.0  ;;  %v1659_v24 = vmul.f32 %v2534_v30, %v2784_v26  ;;  %v720_v18 = vmul.f32 %v3058_v23, %v2482_v60 }
 0x12a   :  { %v3088_v42 = vadd.f32 %v1365_v0, %v1357_v37  ;;  %v689_v27 = vsel %vm496_vm1, %v676_v7, 0.0  ;;  %v721_v20 = vmul.f32 %v3071_v36, %v2497_v4  ;;  %v1701_v22 = vmul.f32 %v2553_v53, %v2777_v38  ;;  %v3619_v0 = vld [vmem:[#allocation9_spill] sm:$0xff] }
 0x12b   :  { %642 = vadd.xlane.f32.xlu1 %v2881_v8  ;;  %v3096_v32 = vadd.f32 %v689_v27, %v675_v61  ;;  %v1666_v49 = vsel %vm496_vm1, %v1659_v24, 0.0  ;;  %v1702_v30 = vmul.f32 %v2558_v62, %v2784_v26  ;;  %v1400_v37 = vmul.f32 %v2329_v35, %v2777_v38 }
 0x12c   :  { %822 = vadd.xlane.f32.xlu0 %v2919_v44  ;;  %v3104_v43 = vadd.f32 %v1666_v49, %v1658_v41  ;;  %v734_v7 = vsel %vm496_vm1, %v721_v20, 0.0  ;;  %v1401_v53 = vmul.f32 %v2343_v40, %v2784_v26  ;;  %v1744_v8 = vmul.f32 %v2588_v29, %v2777_v38 }
 0x12d   :  { %v3111_v61 = vadd.f32 %v734_v7, %v720_v18  ;;  %v1709_v24 = vsel %vm496_vm1, %v1702_v30, 0.0  ;;  %v1745_v62 = vmul.f32 %v2603_v63, %v2784_v26  ;;  %v1443_v35 = vmul.f32 %v2357_v46, %v2777_v38  ;;  %v3620_v63 = vld [vmem:[#allocation10_spill] sm:$0xff]  ;;  %v3621_v46 = vld [vmem:[#allocation7_spill] sm:$0xff]  ;;  %v3622_v30 = vld [vmem:[#allocation8_spill] sm:$0xff] }
 0x12e   :  { %v3118_v44 = vadd.f32 %v1709_v24, %v1701_v22  ;;  %v1408_v41 = vsel %vm496_vm1, %v1401_v53, 0.0  ;;  %v1444_v40 = vmul.f32 %v2362_v47, %v2784_v26  ;;  %v1402_v29 = vmul.f32 %v3619_v0, %v2825_v6  ;;  %v3625_v0 = vld [vmem:[#allocation13_spill] sm:$0xff] }
 0x12f   :  { %687 = vadd.xlane.f32.xlu1 %v2942_v19  ;;  %v3126_v18 = vadd.f32 %v1408_v41, %v1400_v37  ;;  %v1752_v27 = vsel %vm496_vm1, %v1745_v62, 0.0  ;;  %v1403_v20 = vmul.f32 %v3620_v63, %v2832_v52  ;;  %v1486_v22 = vmul.f32 %v3621_v46, %v2777_v38  ;;  %v3623_v19 = vld [vmem:[#allocation16_spill] sm:$0xff]  ;;  %v3624_v62 = vld [vmem:[#allocation17_spill] sm:$0xff]  ;;  %v3627_v46 = vld [vmem:[#allocation19_spill] sm:$0xff] }
 0x130   :  { %867 = vadd.xlane.f32.xlu0 %v2960_v16  ;;  %v3134_v49 = vadd.f32 %v1752_v27, %v1744_v8  ;;  %v1451_v47 = vsel %vm496_vm1, %v1444_v40, 0.0  ;;  %v1487_v7 = vmul.f32 %v3622_v30, %v2784_v26  ;;  %v1445_v37 = vmul.f32 %v3623_v19, %v2825_v6  ;;  %v3626_v27 = vld [vmem:[#allocation14_spill] sm:$0xff] }
 0x131   :  { %v3141_v53 = vadd.f32 %v1451_v47, %v1443_v35  ;;  %v1412_v24 = vsel %vm496_vm1, %v1403_v20, 0.0  ;;  %v1446_v41 = vmul.f32 %v3624_v62, %v2832_v52  ;;  %v1529_v16 = vmul.f32 %v3625_v0, %v2777_v38  ;;  %v3628_v47 = vld [vmem:[#allocation20_spill] sm:$0xff]  ;;  %v3631_v0 = vld [vmem:[#allocation18_spill] sm:$0xff] }
 0x132   :  { %v3148_v8 = vadd.f32 %v1412_v24, %v1402_v29  ;;  %v1494_v40 = vsel %vm496_vm1, %v1487_v7, 0.0  ;;  %v1530_v63 = vmul.f32 %v3626_v27, %v2784_v26  ;;  %v1488_v30 = vmul.f32 %v3627_v46, %v2825_v6  ;;  %v3629_v29 = vld [vmem:[#allocation15_spill] sm:$0xff]  ;;  %v3633_v46 = vld [vmem:[#allocation22_spill] sm:$0xff] }
 0x133   :  { %732 = vadd.xlane.f32.xlu1 %v2993_v28  ;;  %v3156_v35 = vadd.f32 %v1494_v40, %v1486_v22  ;;  %v1455_v20 = vsel %vm496_vm1, %v1446_v41, 0.0  ;;  %v1489_v19 = vmul.f32 %v3628_v47, %v2832_v52  ;;  %v1572_v24 = vmul.f32 %v3629_v29, %v2777_v38  ;;  %v3632_v28 = vld [vmem:[#allocation21_spill] sm:$0xff] }
 0x134   :  { %511 = vadd.xlane.f32.xlu0 %v3011_v51  ;;  %v3164_v7 = vadd.f32 %v1455_v20, %v1445_v37  ;;  %v1537_v62 = vsel %vm496_vm1, %v1530_v63, 0.0  ;;  %v1573_v27 = vmul.f32 %v3631_v0, %v2784_v26  ;;  %v1531_v22 = vmul.f32 %v3632_v28, %v2825_v6  ;;  %v3634_v29 = vld [vmem:[#allocation5_spill] sm:$0xff]  ;;  %v3635_v20 = vld [vmem:[#allocation6_spill] sm:$0xff] }
 0x135   :  { %v3171_v40 = vadd.f32 %v1537_v62, %v1529_v16  ;;  %v1498_v41 = vsel %vm496_vm1, %v1489_v19, 0.0  ;;  %v1532_v47 = vmul.f32 %v3633_v46, %v2832_v52  ;;  %v1615_v51 = vmul.f32 %v3634_v29, %v2777_v38  ;;  %v3637_v62 = vld [vmem:[#allocation24_spill] sm:$0xff]  ;;  %v3638_v38 = vld [vmem:[#allocation29_spill] sm:$0xff] }
 0x136   :  { %3630 = vst [vmem:[#allocation9_spill] sm:$0xff] %v3164_v7  ;;  %v3178_v37 = vadd.f32 %v1498_v41, %v1488_v30  ;;  %v1580_v63 = vsel %vm496_vm1, %v1573_v27, 0.0  ;;  %v1616_v0 = vmul.f32 %v3635_v20, %v2784_v26  ;;  %v3636_v7 = vld [vmem:[#allocation23_spill] sm:$0xff]  ;;  %v1575_v46 = vmul.f32 %v3637_v62, %v2832_v52  ;;  %v3639_v41 = vld [vmem:[#allocation30_spill] sm:$0xff] }
 0x137   :  { %v1574_v28 = vmul.f32 %v3636_v7, %v2825_v6  ;;  %781 = vadd.xlane.f32.xlu1 %v3024_v10  ;;  %v3186_v16 = vadd.f32 %v1580_v63, %v1572_v24  ;;  %v1541_v19 = vsel %vm496_vm1, %v1532_v47, 0.0  ;;  %v1359_v30 = vmul.f32 %v2825_v6, %v3638_v38  ;;  %v3640_v63 = vld [vmem:[#allocation25_spill] sm:$0xff] }
 0x138   :  { %556 = vadd.xlane.f32.xlu0 %v3036_v17  ;;  %v3194_v27 = vadd.f32 %v1541_v19, %v1531_v22  ;;  %v1623_v26 = vsel %vm496_vm1, %v1616_v0, 0.0  ;;  %v1360_v7 = vmul.f32 %v2832_v52, %v3639_v41  ;;  %v1617_v10 = vmul.f32 %v2687_v3, %v2825_v6  ;;  %v3641_v0 = vld [vmem:[#allocation26_spill] sm:$0xff] }
 0x139   :  { %v3201_v24 = vadd.f32 %v1623_v26, %v1615_v51  ;;  %v1584_v47 = vsel %vm496_vm1, %v1575_v46, 0.0  ;;  %v1618_v29 = vmul.f32 %v2699_v2, %v2832_v52  ;;  %v1660_v17 = vmul.f32 %v3640_v63, %v2825_v6  ;;  %v3645_v63 = vld [vmem:[#allocation32_spill] sm:$0xff] }
 0x13a   :  { %v3208_v22 = vadd.f32 %v1584_v47, %v1574_v28  ;;  %v1369_v20 = vsel %vm496_vm1, %v1360_v7, 0.0  ;;  %v1661_v19 = vmul.f32 %v3641_v0, %v2832_v52  ;;  %v1361_v3 = vmul.f32 %v2878_v39, %v2730_v11  ;;  %v3642_v28 = vld [vmem:[#allocation27_spill] sm:$0xff]  ;;  %v3643_v11 = vld [vmem:[#allocation28_spill] sm:$0xff] }
 0x13b   :  { %826 = vadd.xlane.f32.xlu1 %v3048_v50  ;;  %v3216_v51 = vadd.f32 %v1369_v20, %v1359_v30  ;;  %v1627_v62 = vsel %vm496_vm1, %v1618_v29, 0.0  ;;  %v1362_v2 = vmul.f32 %v2890_v59, %v2746_v33  ;;  %v1703_v46 = vmul.f32 %v3642_v28, %v2825_v6  ;;  %v3644_v47 = vld [vmem:[#allocation31_spill] sm:$0xff] }
 0x13c   :  { %601 = vadd.xlane.f32.xlu0 %v3061_v1  ;;  %v3224_v38 = vadd.f32 %v1627_v62, %v1617_v10  ;;  %v1670_v26 = vsel %vm496_vm1, %v1661_v19, 0.0  ;;  %v1704_v41 = vmul.f32 %v3643_v11, %v2832_v52  ;;  %v1404_v50 = vmul.f32 %v2712_v21, %v2878_v39 }
 0x13d   :  { %v3231_v30 = vadd.f32 %v1670_v26, %v1660_v17  ;;  %v1373_v7 = vsel %vm496_vm1, %v1362_v2, 0.0  ;;  %v1405_v33 = vmul.f32 %v2717_v25, %v2890_v59  ;;  %v1746_v1 = vmul.f32 %v3644_v47, %v2825_v6  ;;  %v3646_v6 = vld [vmem:[#allocation33_spill] sm:$0xff] }
 0x13e   :  { %v3238_v10 = vadd.f32 %v1373_v7, %v1361_v3  ;;  %v1713_v29 = vsel %vm496_vm1, %v1704_v41, 0.0  ;;  %v1747_v20 = vmul.f32 %v3645_v63, %v2832_v52  ;;  %v1447_v21 = vmul.f32 %v2758_v31, %v2878_v39 }
 0x13f   :  { %871 = vadd.xlane.f32.xlu1 %v3074_v14  ;;  %v3246_v17 = vadd.f32 %v1713_v29, %v1703_v46  ;;  %v1416_v0 = vsel %vm496_vm1, %v1405_v33, 0.0  ;;  %v1448_v25 = vmul.f32 %v2763_v57, %v2890_v59  ;;  %v1619_v19 = vmul.f32 %v3646_v6, %v2878_v39  ;;  %v3651_v29 = vld [vmem:[#allocation42_spill] sm:$0xff] }
 0x140   :  { %646 = vadd.xlane.f32.xlu0 %v3081_v34  ;;  %v3254_v3 = vadd.f32 %v1416_v0, %v1404_v50  ;;  %v1756_v52 = vsel %vm496_vm1, %v1747_v20, 0.0  ;;  %v1620_v31 = vmul.f32 %v2794_v58, %v2890_v59  ;;  %v1490_v14 = vmul.f32 %v2806_v15, %v2878_v39  ;;  %v3653_v0 = vld [vmem:[#allocation45_spill] sm:$0xff] }
 0x141   :  { %v3261_v62 = vadd.f32 %v1756_v52, %v1746_v1  ;;  %v1459_v2 = vsel %vm496_vm1, %v1448_v25, 0.0  ;;  %v1491_v57 = vmul.f32 %v2811_v45, %v2890_v59  ;;  %v1662_v34 = vmul.f32 %v2823_v55, %v2878_v39 }
 0x142   :  { %v3268_v28 = vadd.f32 %v1459_v2, %v1447_v21  ;;  %v1631_v46 = vsel %vm496_vm1, %v1620_v31, 0.0  ;;  %v1663_v58 = vmul.f32 %v2842_v13, %v2890_v59  ;;  %v1533_v15 = vmul.f32 %v2854_v9, %v2878_v39  ;;  %v3647_v9 = vld [vmem:[#allocation34_spill] sm:$0xff] }
 0x143   :  { %1367 = vadd.xlane.f32.xlu1 %v3088_v42  ;;  %v3276_v26 = vadd.f32 %v1631_v46, %v1619_v19  ;;  %v1502_v11 = vsel %vm496_vm1, %v1491_v57, 0.0  ;;  %v1534_v45 = vmul.f32 %v2859_v12, %v2890_v59  ;;  %v1705_v55 = vmul.f32 %v2871_v5, %v2878_v39  ;;  %v3648_v42 = vld [vmem:[#allocation35_spill] sm:$0xff]  ;;  %v3649_v12 = vld [vmem:[#allocation36_spill] sm:$0xff]  ;;  %v3650_v5 = vld [vmem:[#allocation37_spill] sm:$0xff] }
 0x144   :  { %691 = vadd.xlane.f32.xlu0 %v3096_v32  ;;  %v3284_v41 = vadd.f32 %v1502_v11, %v1490_v14  ;;  %v1674_v13 = vsel %vm496_vm1, %v1663_v58, 0.0  ;;  %v1706_v50 = vmul.f32 %v3647_v9, %v2890_v59  ;;  %v1576_v7 = vmul.f32 %v3648_v42, %v2878_v39  ;;  %v3652_v21 = vld [vmem:[#allocation38_spill] sm:$0xff]  ;;  %v3654_v14 = vld [vmem:[#allocation41_spill] sm:$0xff]  ;;  %v3659_v42 = vld [vmem:[#allocation44_spill] sm:$0xff] }
 0x145   :  { %v3291_v33 = vadd.f32 %v1674_v13, %v1662_v34  ;;  %v1545_v47 = vsel %vm496_vm1, %v1534_v45, 0.0  ;;  %v1577_v1 = vmul.f32 %v3649_v12, %v2890_v59  ;;  %v1363_v32 = vmul.f32 %v3651_v29, %v3650_v5 }
 0x146   :  { %v3298_v63 = vadd.f32 %v1545_v47, %v1533_v15  ;;  %v1717_v20 = vsel %vm496_vm1, %v1706_v50, 0.0  ;;  %v1364_v25 = vmul.f32 %v3653_v0, %v3652_v21  ;;  %v1578_v6 = vmul.f32 %v3058_v23, %v3651_v29  ;;  %v3655_v23 = vld [vmem:[#allocation43_spill] sm:$0xff]  ;;  %v3661_v21 = vld [vmem:[#allocation50_spill] sm:$0xff] }
 0x147   :  { %1668 = vadd.xlane.f32.xlu1 %v3104_v43  ;;  %v3306_v19 = vadd.f32 %v1717_v20, %v1705_v55  ;;  %v1588_v52 = vsel %vm496_vm1, %v1577_v1, 0.0  ;;  %v1579_v31 = vmul.f32 %v3071_v36, %v3653_v0  ;;  %v1406_v2 = vmul.f32 %v3654_v14, %v3651_v29  ;;  %v3656_v43 = vld [vmem:[#allocation39_spill] sm:$0xff]  ;;  %v3657_v36 = vld [vmem:[#allocation40_spill] sm:$0xff]  ;;  %v3660_v1 = vld [vmem:[#allocation46_spill] sm:$0xff] }
 0x148   :  { %736 = vadd.xlane.f32.xlu0 %v3111_v61  ;;  %v3314_v57 = vadd.f32 %v1588_v52, %v1576_v7  ;;  %v1377_v34 = vsel %vm496_vm1, %v1364_v25, 0.0  ;;  %v1407_v46 = vmul.f32 %v3655_v23, %v3653_v0  ;;  %v1621_v58 = vmul.f32 %v3656_v43, %v3651_v29  ;;  %v3658_v55 = vld [vmem:[#allocation47_spill] sm:$0xff]  ;;  %v3663_v14 = vld [vmem:[#allocation49_spill] sm:$0xff] }
 0x149   :  { %v3321_v15 = vadd.f32 %v1377_v34, %v1363_v32  ;;  %v1592_v11 = vsel %vm496_vm1, %v1579_v31, 0.0  ;;  %v1622_v45 = vmul.f32 %v3657_v36, %v3653_v0  ;;  %v1449_v61 = vmul.f32 %v3658_v55, %v3651_v29  ;;  %v1892_v52 = vld [vmem:[%s3514_s3 + $0x270] sm:$0xff]  ;;  %v1890_v36 = vld [vmem:[%s3514_s3 + $0x260] sm:$0xff] }
 0x14a   :  { %v3328_v13 = vadd.f32 %v1592_v11, %v1578_v6  ;;  %v1420_v9 = vsel %vm496_vm1, %v1407_v46, 0.0  ;;  %v1450_v50 = vmul.f32 %v2986_v56, %v3653_v0  ;;  %v1664_v7 = vmul.f32 %v3659_v42, %v3651_v29  ;;  %v3664_v34 = vld [vmem:[#allocation51_spill] sm:$0xff]  ;;  %v1891_v46 = vld [vmem:[%s3514_s3 + $0x268] sm:$0xff] }
 0x14b   :  { %1711 = vadd.xlane.f32.xlu1 %v3118_v44  ;;  %v3336_v47 = vadd.f32 %v1420_v9, %v1406_v2  ;;  %v1635_v12 = vsel %vm496_vm1, %v1622_v45, 0.0  ;;  %v1665_v5 = vmul.f32 %v3660_v1, %v3653_v0  ;;  %v1492_v32 = vmul.f32 %v3008_v48, %v3651_v29  ;;  %v3662_v44 = vld [vmem:[#allocation48_spill] sm:$0xff] }
 0x14c   :  { %1410 = vadd.xlane.f32.xlu0 %v3126_v18  ;;  %v3344_v20 = vadd.f32 %v1635_v12, %v1621_v58  ;;  %v1463_v56 = vsel %vm496_vm1, %v1450_v50, 0.0  ;;  %v1493_v25 = vmul.f32 %v3661_v21, %v3653_v0  ;;  %v1707_v6 = vmul.f32 %v3662_v44, %v3651_v29  ;;  %v1893_v48 = vld [vmem:[%s3514_s3 + $0x278] sm:$0xff] }
 0x14d   :  { %v1464_v31 = vadd.f32 %v1463_v56, %v1449_v61  ;;  %v1678_v18 = vsel %vm496_vm1, %v1665_v5, 0.0  ;;  %v1708_v2 = vmul.f32 %v3663_v14, %v3653_v0  ;;  %v1535_v23 = vmul.f32 %v3664_v34, %v3651_v29  ;;  %v3667_v14 = vld [vmem:[#allocation9_spill] sm:$0xff] }
 0x14e   :  { %v1679_v43 = vadd.f32 %v1678_v18, %v1664_v7  ;;  %v1506_v58 = vsel %vm496_vm1, %v1493_v25, 0.0  ;;  %v1536_v11 = vmul.f32 %v3046_v54, %v3653_v0  ;;  %v900_v61 = vmul.f32 %v1892_v52, %v2482_v60  ;;  %v3665_v7 = vld [vmem:[#allocation12_spill] sm:$0xff] }
 0x14f   :  { %1754 = vadd.xlane.f32.xlu1 %v3134_v49  ;;  %v1507_v45 = vadd.f32 %v1506_v58, %v1492_v32  ;;  %v1721_v55 = vsel %vm496_vm1, %v1708_v2, 0.0  ;;  %v901_v9 = vmul.f32 %v1893_v48, %v2497_v4  ;;  %v899_v54 = vmul.f32 %v1891_v46, %v3665_v7  ;;  %v3666_v49 = vld [vmem:[#allocation11_spill] sm:$0xff] }
 0x150   :  { %1453 = vadd.xlane.f32.xlu0 %v3141_v53  ;;  %v1722_v50 = vadd.f32 %v1721_v55, %v1707_v6  ;;  %v1549_v42 = vsel %vm496_vm1, %v1536_v11, 0.0  ;;  %v1748_v12 = vmul.f32 %v1890_v36, %v2878_v39  ;;  %v898_v32 = vmul.f32 %v1890_v36, %v3666_v49 }
 0x151   :  { %v1550_v1 = vadd.f32 %v1549_v42, %v1535_v23  ;;  %v914_v5 = vsel %vm496_vm1, %v901_v9, 0.0  ;;  %v1749_v56 = vmul.f32 %v1891_v46, %v2890_v59  ;;  %v910_v60 = vsel %vm496_vm1, %v899_v54, 0.0 }
 0x152   :  { %v915_v21 = vadd.f32 %v914_v5, %v900_v61  ;;  %v1751_v4 = vmul.f32 %v1893_v48, %v3653_v0  ;;  %v911_v53 = vadd.f32 %v910_v60, %v898_v32  ;;  %v1750_v44 = vmul.f32 %v1892_v52, %v3651_v29 }
 0x153   :  { %1414 = vadd.xlane.f32.xlu1 %v3148_v8  ;;  %v1760_v25 = vsel %vm496_vm1, %v1749_v56, 0.0  ;;  %v29_v32 = vlaneseq }
 0x154   :  { %1496 = vadd.xlane.f32.xlu0 %v3156_v35  ;;  %v1761_v39 = vadd.f32 %v1760_v25, %v1748_v12  ;;  %v1764_v6 = vsel %vm496_vm1, %v1751_v4, 0.0 }
 0x155   :  { %v1765_v18 = vadd.f32 %v1764_v6, %v1750_v44 }
 0x157   :  { %1457 = vadd.xlane.f32.xlu1 %v3667_v14 }
 0x158   :  { %1539 = vadd.xlane.f32.xlu0 %v3171_v40 }
 0x15b   :  { %1500 = vadd.xlane.f32.xlu1 %v3178_v37 }
 0x15c   :  { %1582 = vadd.xlane.f32.xlu0 %v3186_v16 }
 0x15f   :  { %1543 = vadd.xlane.f32.xlu1 %v3194_v27 }
 0x160   :  { %1625 = vadd.xlane.f32.xlu0 %v3201_v24 }
 0x163   :  { %1586 = vadd.xlane.f32.xlu1 %v3208_v22 }
 0x164   :  { %1371 = vadd.xlane.f32.xlu0 %v3216_v51 }
 0x167   :  { %1629 = vadd.xlane.f32.xlu1 %v3224_v38 }
 0x168   :  { %1672 = vadd.xlane.f32.xlu0 %v3231_v30 }
 0x16b   :  { %1375 = vadd.xlane.f32.xlu1 %v3238_v10 }
 0x16c   :  { %1715 = vadd.xlane.f32.xlu0 %v3246_v17 }
 0x16f   :  { %1418 = vadd.xlane.f32.xlu1 %v3254_v3 }
 0x170   :  { %1758 = vadd.xlane.f32.xlu0 %v3261_v62 }
 0x173   :  { %1461 = vadd.xlane.f32.xlu1 %v3268_v28 }
 0x174   :  { %1633 = vadd.xlane.f32.xlu0 %v3276_v26 }
 0x177   :  { %1504 = vadd.xlane.f32.xlu1 %v3284_v41 }
 0x178   :  { %1676 = vadd.xlane.f32.xlu0 %v3291_v33 }
 0x17b   :  { %1547 = vadd.xlane.f32.xlu1 %v3298_v63 }
 0x17c   :  { %1719 = vadd.xlane.f32.xlu0 %v3306_v19 }
 0x17f   :  { %1590 = vadd.xlane.f32.xlu1 %v3314_v57 }
 0x180   :  { %1379 = vadd.xlane.f32.xlu0 %v3321_v15 }
 0x183   :  { %1594 = vadd.xlane.f32.xlu1 %v3328_v13 }
 0x184   :  { %1422 = vadd.xlane.f32.xlu0 %v3336_v47 }
 0x187   :  { %1637 = vadd.xlane.f32.xlu1 %v3344_v20  ;;  %v545_v59 = vpop.xlane.xlu1 %544  ;;  %v500_v8 = vpop.xlane.xlu0 %499 }
 0x188   :  { %1465 = vadd.xlane.f32.xlu0 %v1464_v31 }
 0x18b   :  { %1680 = vadd.xlane.f32.xlu1 %v1679_v43  ;;  %v590_v35 = vpop.xlane.xlu1 %589 }
 0x18c   :  { %1508 = vadd.xlane.f32.xlu0 %v1507_v45  ;;  %v770_v40 = vpop.xlane.xlu0 %769 }
 0x18f   :  { %1723 = vadd.xlane.f32.xlu1 %v1722_v50  ;;  %v635_v37 = vpop.xlane.xlu1 %634 }
 0x190   :  { %1551 = vadd.xlane.f32.xlu0 %v1550_v1  ;;  %v549_v16 = vpop.xlane.xlu0 %548 }
 0x191   :  { %v558_v27 = vadd.f32 %v549_v16, %v545_v59 }
 0x193   :  { %916 = vadd.xlane.f32.xlu1 %v915_v21  ;;  %v680_v24 = vpop.xlane.xlu1 %679 }
 0x194   :  { %912 = vadd.xlane.f32.xlu0 %v911_v53  ;;  %v594_v22 = vpop.xlane.xlu0 %593 }
 0x195   :  { %v603_v51 = vadd.f32 %v594_v22, %v590_v35 }
 0x197   :  { %v725_v38 = vpop.xlane.xlu1 %724 }
 0x198   :  { %1762 = vadd.xlane.f32.xlu0 %v1761_v39  ;;  %v639_v30 = vpop.xlane.xlu0 %638  ;;  %v3416_v39 = vand.u32 127, %v29_v32 }
 0x199   :  { %v648_v10 = vadd.f32 %v639_v30, %v635_v37 }
 0x19a   :  { %vm522_vm2 = vcmp.eq.s32.totalorder %v3416_v39, 0  ;;  %vm567_vm3 = vcmp.eq.s32.totalorder %v3416_v39, 1  ;;  %vm612_vm4 = vcmp.eq.s32.totalorder %v3416_v39, 2  ;;  %vm657_vm5 = vcmp.eq.s32.totalorder %v3416_v39, 3 }
 0x19b   :  { %v815_v17 = vpop.xlane.xlu1 %814  ;;  %vm702_vm6 = vcmp.eq.s32.totalorder %v3416_v39, 4  ;;  %vm747_vm7 = vcmp.eq.s32.totalorder %v3416_v39, 5  ;;  %vm792_vm8 = vcmp.eq.s32.totalorder %v3416_v39, 6  ;;  %vm837_vm9 = vcmp.eq.s32.totalorder %v3416_v39, 7 }
 0x19c   :  { %1766 = vadd.xlane.f32.xlu0 %v1765_v18  ;;  %v684_v3 = vpop.xlane.xlu0 %683  ;;  %vm882_vm10 = vcmp.eq.s32.totalorder %v3416_v39, 8  ;;  %vm927_vm11 = vcmp.eq.s32.totalorder %v3416_v39, 9 }
 0x19d   :  { %v693_v62 = vadd.f32 %v684_v3, %v680_v24  ;;  %v479_v3 = vld [vmem:[%s3515_s4] sm:$0x1] }
 0x19f   :  { %v860_v28 = vpop.xlane.xlu1 %859 }
 0x1a0   :  { %v729_v26 = vpop.xlane.xlu0 %728 }
 0x1a1   :  { %v738_v41 = vadd.f32 %v729_v26, %v725_v38 }
 0x1a3   :  { %v905_v33 = vpop.xlane.xlu1 %904 }
 0x1a4   :  { %v819_v29 = vpop.xlane.xlu0 %818 }
 0x1a5   :  { %v828_v63 = vadd.f32 %v819_v29, %v815_v17 }
 0x1a7   :  { %v504_v0 = vpop.xlane.xlu1 %503 }
 0x1a8   :  { %v864_v19 = vpop.xlane.xlu0 %863  ;;  %v513_v57 = vadd.f32 %v504_v0, %v500_v8 }
 0x1a9   :  { %v873_v15 = vadd.f32 %v864_v19, %v860_v28 }
 0x1ab   :  { %v774_v13 = vpop.xlane.xlu1 %773 }
 0x1ac   :  { %v909_v47 = vpop.xlane.xlu0 %908  ;;  %v783_v20 = vadd.f32 %v774_v13, %v770_v40 }
 0x1ad   :  { %v3414_v52 = vadd.f32 %v909_v47, %v905_v33 }
 0x1b0   :  { %v553_v48 = vpop.xlane.xlu1 %552 }
 0x1b1   :  { %v559_v31 = vadd.f32 %v558_v27, %v553_v48  ;;  %v508_v2 = vpop.xlane.xlu0 %507 }
 0x1b2   :  { %v514_v34 = vadd.f32 %v513_v57, %v508_v2 }
 0x1b4   :  { %v598_v23 = vpop.xlane.xlu1 %597 }
 0x1b5   :  { %v604_v46 = vadd.f32 %v603_v51, %v598_v23  ;;  %v778_v43 = vpop.xlane.xlu0 %777 }
 0x1b6   :  { %v784_v58 = vadd.f32 %v783_v20, %v778_v43 }
 0x1b8   :  { %v643_v11 = vpop.xlane.xlu1 %642 }
 0x1b9   :  { %v649_v36 = vadd.f32 %v648_v10, %v643_v11  ;;  %v823_v45 = vpop.xlane.xlu0 %822 }
 0x1ba   :  { %v829_v55 = vadd.f32 %v828_v63, %v823_v45 }
 0x1bc   :  { %v688_v61 = vpop.xlane.xlu1 %687 }
 0x1bd   :  { %v694_v9 = vadd.f32 %v693_v62, %v688_v61  ;;  %v868_v50 = vpop.xlane.xlu0 %867 }
 0x1be   :  { %v874_v42 = vadd.f32 %v873_v15, %v868_v50 }
 0x1c0   :  { %v733_v7 = vpop.xlane.xlu1 %732 }
 0x1c1   :  { %v739_v54 = vadd.f32 %v738_v41, %v733_v7  ;;  %v512_v12 = vpop.xlane.xlu0 %511 }
 0x1c2   :  { %v515_v1 = vadd.f32 %v514_v34, %v512_v12 }
 0x1c4   :  { %v516_v5 = vrot.slane %v515_v1, 4  ;;  %v782_v49 = vpop.xlane.xlu1 %781 }
 0x1c5   :  { %v785_v56 = vadd.f32 %v784_v58, %v782_v49  ;;  %v557_v21 = vpop.xlane.xlu0 %556 }
 0x1c6   :  { %v517_v60 = vadd.f32 %v516_v5, %v515_v1  ;;  %v560_v4 = vadd.f32 %v559_v31, %v557_v21 }
 0x1c7   :  { %v786_v27 = vrot.slane %v785_v56, 4 }
 0x1c8   :  { %v518_v53 = vrot.slane %v517_v60, 2  ;;  %v561_v25 = vrot.slane %v560_v4, 4  ;;  %v827_v44 = vpop.xlane.xlu1 %826 }
 0x1c9   :  { %v830_v6 = vadd.f32 %v829_v55, %v827_v44  ;;  %v602_v18 = vpop.xlane.xlu0 %601  ;;  %v787_v29 = vadd.f32 %v786_v27, %v785_v56 }
 0x1ca   :  { %v519_v14 = vadd.f32 %v518_v53, %v517_v60  ;;  %v562_v59 = vadd.f32 %v561_v25, %v560_v4  ;;  %v605_v8 = vadd.f32 %v604_v46, %v602_v18 }
 0x1cb   :  { %v831_v17 = vrot.slane %v830_v6, 4  ;;  %v788_v46 = vrot.slane %v787_v29, 2 }
 0x1cc   :  { %v520_v35 = vrot.slane %v519_v14, 1  ;;  %v563_v40 = vrot.slane %v562_v59, 2  ;;  %v606_v37 = vrot.slane %v605_v8, 4  ;;  %v872_v16 = vpop.xlane.xlu1 %871 }
 0x1cd   :  { %v875_v24 = vadd.f32 %v874_v42, %v872_v16  ;;  %v647_v22 = vpop.xlane.xlu0 %646  ;;  %v832_v20 = vadd.f32 %v831_v17, %v830_v6  ;;  %v789_v5 = vadd.f32 %v788_v46, %v787_v29 }
 0x1ce   :  { %v521_v51 = vadd.f32 %v520_v35, %v519_v14  ;;  %v564_v38 = vadd.f32 %v563_v40, %v562_v59  ;;  %v607_v30 = vadd.f32 %v606_v37, %v605_v8  ;;  %v650_v10 = vadd.f32 %v649_v36, %v647_v22 }
 0x1cf   :  { %v876_v63 = vrot.slane %v875_v24, 4  ;;  %v790_v59 = vrot.slane %v789_v5, 1 }
 0x1d0   :  { %v523_v62 = vsel %vm522_vm2, %v521_v51, 0.0  ;;  %v565_v28 = vrot.slane %v564_v38, 1  ;;  %v608_v26 = vrot.slane %v607_v30, 2  ;;  %v651_v41 = vrot.slane %v650_v10, 4  ;;  %v3424_v33 = vpop.xlane.xlu1 %1367 }
 0x1d1   :  { %v692_v0 = vpop.xlane.xlu0 %691  ;;  %v524_v47 = vadd.f32 %v523_v62, %v479_v3  ;;  %v877_v58 = vadd.f32 %v876_v63, %v875_v24 }
 0x1d2   :  { %v566_v19 = vadd.f32 %v565_v28, %v564_v38  ;;  %v609_v57 = vadd.f32 %v608_v26, %v607_v30  ;;  %v652_v15 = vadd.f32 %v651_v41, %v650_v10  ;;  %v695_v13 = vadd.f32 %v694_v9, %v692_v0 }
 0x1d3   :  { %v833_v9 = vrot.slane %v832_v20, 2  ;;  %v878_v56 = vrot.slane %v877_v58, 2  ;;  %v791_v38 = vadd.f32 %v790_v59, %v789_v5 }
 0x1d4   :  { %v568_v48 = vsel %vm567_vm3, %v566_v19, 0.0  ;;  %v610_v31 = vrot.slane %v609_v57, 1  ;;  %v653_v2 = vrot.slane %v652_v15, 2  ;;  %v696_v34 = vrot.slane %v695_v13, 4  ;;  %v3429_v23 = vpop.xlane.xlu1 %1668 }
 0x1d5   :  { %v569_v43 = vadd.f32 %v568_v48, %v524_v47  ;;  %v737_v11 = vpop.xlane.xlu0 %736  ;;  %v879_v8 = vadd.f32 %v878_v56, %v877_v58  ;;  %v793_v41 = vsel %vm792_vm8, %v791_v38, 0.0 }
 0x1d6   :  { %v611_v36 = vadd.f32 %v610_v31, %v609_v57  ;;  %v654_v45 = vadd.f32 %v653_v2, %v652_v15  ;;  %v697_v55 = vadd.f32 %v696_v34, %v695_v13  ;;  %v740_v61 = vadd.f32 %v739_v54, %v737_v11 }
 0x1d7   :  { %v834_v54 = vadd.f32 %v833_v9, %v832_v20  ;;  %v880_v30 = vrot.slane %v879_v8, 1 }
 0x1d8   :  { %v613_v50 = vsel %vm612_vm4, %v611_v36, 0.0  ;;  %v655_v42 = vrot.slane %v654_v45, 1  ;;  %v698_v7 = vrot.slane %v697_v55, 2  ;;  %v741_v12 = vrot.slane %v740_v61, 4  ;;  %v3434_v1 = vpop.xlane.xlu1 %1711 }
 0x1d9   :  { %v614_v49 = vadd.f32 %v613_v50, %v569_v43  ;;  %v3437_v32 = vpop.xlane.xlu0 %1410  ;;  %v835_v37 = vrot.slane %v834_v54, 1  ;;  %v881_v29 = vadd.f32 %v880_v30, %v879_v8 }
 0x1da   :  { %v656_v21 = vadd.f32 %v655_v42, %v654_v45  ;;  %v699_v60 = vadd.f32 %v698_v7, %v697_v55  ;;  %v742_v4 = vadd.f32 %v741_v12, %v740_v61 }
 0x1db   :  { %v836_v17 = vadd.f32 %v835_v37, %v834_v54  ;;  %v883_v13 = vsel %vm882_vm10, %v881_v29, 0.0 }
 0x1dc   :  { %v658_v53 = vsel %vm657_vm5, %v656_v21, 0.0  ;;  %v700_v25 = vrot.slane %v699_v60, 1  ;;  %v743_v44 = vrot.slane %v742_v4, 2  ;;  %v3441_v6 = vpop.xlane.xlu1 %1754 }
 0x1dd   :  { %v659_v18 = vadd.f32 %v658_v53, %v614_v49  ;;  %v1454_v14 = vpop.xlane.xlu0 %1453  ;;  %v838_v0 = vsel %vm837_vm9, %v836_v17, 0.0 }
 0x1de   :  { %v701_v35 = vadd.f32 %v700_v25, %v699_v60  ;;  %v744_v40 = vadd.f32 %v743_v44, %v742_v4 }
 0x1e0   :  { %v703_v16 = vsel %vm702_vm6, %v701_v35, 0.0  ;;  %v745_v27 = vrot.slane %v744_v40, 1  ;;  %v1415_v24 = vpop.xlane.xlu1 %1414 }
 0x1e1   :  { %v704_v22 = vadd.f32 %v703_v16, %v659_v18  ;;  %v1497_v51 = vpop.xlane.xlu0 %1496  ;;  %v1424_v56 = vadd.f32 %v1415_v24, %v3437_v32 }
 0x1e2   :  { %v746_v10 = vadd.f32 %v745_v27, %v744_v40 }
 0x1e4   :  { %v748_v3 = vsel %vm747_vm7, %v746_v10, 0.0  ;;  %v1458_v62 = vpop.xlane.xlu1 %1457 }
 0x1e5   :  { %v749_v28 = vadd.f32 %v748_v3, %v704_v22  ;;  %v3451_v26 = vpop.xlane.xlu0 %1539  ;;  %v1467_v59 = vadd.f32 %v1458_v62, %v1454_v14 }
 0x1e7   :  { %v794_v63 = vadd.f32 %v793_v41, %v749_v28 }
 0x1e8   :  { %v1501_v19 = vpop.xlane.xlu1 %1500 }
 0x1e9   :  { %v1583_v57 = vpop.xlane.xlu0 %1582  ;;  %v839_v15 = vadd.f32 %v838_v0, %v794_v63  ;;  %v1510_v30 = vadd.f32 %v1501_v19, %v1497_v51 }
 0x1eb   :  { %v3460_v47 = vadd.f32 %v883_v13, %v839_v15 }
 0x1ec   :  { %v1544_v20 = vpop.xlane.xlu1 %1543 }
 0x1ed   :  { %v1626_v48 = vpop.xlane.xlu0 %1625  ;;  %v1553_v51 = vadd.f32 %v1544_v20, %v3451_v26 }
 0x1f0   :  { %v1587_v31 = vpop.xlane.xlu1 %1586 }
 0x1f1   :  { %v1372_v2 = vpop.xlane.xlu0 %1371  ;;  %v1596_v21 = vadd.f32 %v1587_v31, %v1583_v57 }
 0x1f2   :  { %v1381_v7 = vadd.f32 %v1372_v2, %v3424_v33 }
 0x1f4   :  { %v1630_v34 = vpop.xlane.xlu1 %1629 }
 0x1f5   :  { %v1673_v46 = vpop.xlane.xlu0 %1672  ;;  %v1639_v44 = vadd.f32 %v1630_v34, %v1626_v48 }
 0x1f6   :  { %v1682_v38 = vadd.f32 %v1673_v46, %v3429_v23 }
 0x1f8   :  { %v1376_v43 = vpop.xlane.xlu1 %1375 }
 0x1f9   :  { %v1716_v58 = vpop.xlane.xlu0 %1715  ;;  %v1382_v12 = vadd.f32 %v1381_v7, %v1376_v43 }
 0x1fa   :  { %v1725_v0 = vadd.f32 %v1716_v58, %v3434_v1 }
 0x1fc   :  { %v1419_v11 = vpop.xlane.xlu1 %1418 }
 0x1fd   :  { %v3462_v36 = vpop.xlane.xlu0 %1758  ;;  %v1425_v4 = vadd.f32 %v1424_v56, %v1419_v11 }
 0x200   :  { %v1462_v45 = vpop.xlane.xlu1 %1461 }
 0x201   :  { %v1634_v55 = vpop.xlane.xlu0 %1633  ;;  %v1468_v16 = vadd.f32 %v1467_v59, %v1462_v45  ;;  %v1348_v59 = vld [vmem:[%s3515_s4] sm:$0x1]  ;;  %s2061_s4 = smov [#allocation2]  }
 0x202   :  { %v1640_v37 = vadd.f32 %v1639_v44, %v1634_v55  ;;  %s1786_s16 = sshll.u32 %s2061_s4, 4  ;;  %s1787_s16 = int_to_ptr.vmem [resolvable:$true] %s1786_s16 }
 0x203   :  { %s2035_s17 = scalar_lea.vmem %s1787_s16, 32  ;;  %p2040_p1 = scmp.lt.s32.totalorder %s1787_s16, %s1787_s16 }
 0x204   :  { %v1505_v61 = vpop.xlane.xlu1 %1504  ;;  %p2036_p0 = scmp.ne.s32.totalorder %s1787_s16, %s2035_s17  ;;  %p2041_p2 = scmp.lt.s32.totalorder %s2035_s17, %s2035_s17 }
 0x205   :  { %v1677_v9 = vpop.xlane.xlu0 %1676  ;;  %v1511_v29 = vadd.f32 %v1510_v30, %v1505_v61  ;;  %v1768_v30 = vadd.f32 %v3462_v36, %v3441_v6 }
 0x206   :  { %v1683_v28 = vadd.f32 %v1682_v38, %v1677_v9  ;;  %p2042_p3 = por %p2041_p2, %p2040_p1 }
 0x208   :  { %v1548_v50 = vpop.xlane.xlu1 %1547  ;;  %p2043_p4 = pnand %p2042_p3, %p2036_p0 }
 0x209   :  { %v1720_v42 = vpop.xlane.xlu0 %1719  ;;  %v1554_v55 = vadd.f32 %v1553_v51, %v1548_v50 }
 0x20a   :  { %v1726_v46 = vadd.f32 %v1725_v0, %v1720_v42 }
 0x20c   :  { %v1591_v5 = vpop.xlane.xlu1 %1590 }
 0x20d   :  { %v1380_v49 = vpop.xlane.xlu0 %1379  ;;  %v1597_v54 = vadd.f32 %v1596_v21, %v1591_v5 }
 0x20e   :  { %v1383_v60 = vadd.f32 %v1382_v12, %v1380_v49 }
 0x210   :  { %v1384_v53 = vrot.slane %v1383_v60, 4  ;;  %v1595_v25 = vpop.xlane.xlu1 %1594 }
 0x211   :  { %v1423_v18 = vpop.xlane.xlu0 %1422  ;;  %v1598_v35 = vadd.f32 %v1597_v54, %v1595_v25 }
 0x212   :  { %v1385_v8 = vadd.f32 %v1384_v53, %v1383_v60  ;;  %v1426_v40 = vadd.f32 %v1425_v4, %v1423_v18 }
 0x213   :  { %v1599_v10 = vrot.slane %v1598_v35, 4 }
 0x214   :  { %v1386_v33 = vrot.slane %v1385_v8, 2  ;;  %v1427_v27 = vrot.slane %v1426_v40, 4  ;;  %v1638_v22 = vpop.xlane.xlu1 %1637 }
 0x215   :  { %v1641_v32 = vadd.f32 %v1640_v37, %v1638_v22  ;;  %v1466_v24 = vpop.xlane.xlu0 %1465  ;;  %v1600_v48 = vadd.f32 %v1599_v10, %v1598_v35 }
 0x216   :  { %v1428_v17 = vadd.f32 %v1427_v27, %v1426_v40  ;;  %v1469_v3 = vadd.f32 %v1468_v16, %v1466_v24  ;;  %v1387_v41 = vadd.f32 %v1386_v33, %v1385_v8 }
 0x217   :  { %v1642_v57 = vrot.slane %v1641_v32, 4  ;;  %v1601_v1 = vrot.slane %v1600_v48, 2 }
 0x218   :  { %v1429_v14 = vrot.slane %v1428_v17, 2  ;;  %v1470_v62 = vrot.slane %v1469_v3, 4  ;;  %v1681_v63 = vpop.xlane.xlu1 %1680  ;;  %v1388_v19 = vrot.slane %v1387_v41, 1 }
 0x219   :  { %v1684_v15 = vadd.f32 %v1683_v28, %v1681_v63  ;;  %v1509_v13 = vpop.xlane.xlu0 %1508  ;;  %v1643_v9 = vadd.f32 %v1642_v57, %v1641_v32  ;;  %v1602_v25 = vadd.f32 %v1601_v1, %v1600_v48 }
 0x21a   :  { %v1430_v31 = vadd.f32 %v1429_v14, %v1428_v17  ;;  %v1471_v23 = vadd.f32 %v1470_v62, %v1469_v3  ;;  %v1512_v2 = vadd.f32 %v1511_v29, %v1509_v13  ;;  %v1389_v49 = vadd.f32 %v1388_v19, %v1387_v41 }
 0x21b   :  { %v1685_v34 = vrot.slane %v1684_v15, 4  ;;  %v1644_v54 = vrot.slane %v1643_v9, 2  ;;  %v1603_v28 = vrot.slane %v1602_v25, 1 }
 0x21c   :  { %v1472_v43 = vrot.slane %v1471_v23, 2  ;;  %v1513_v11 = vrot.slane %v1512_v2, 4  ;;  %v1724_v45 = vpop.xlane.xlu1 %1723  ;;  %v1431_v61 = vrot.slane %v1430_v31, 1  ;;  %v1390_v8 = vsel %vm522_vm2, %v1389_v49, 0.0 }
 0x21d   :  { %v1552_v7 = vpop.xlane.xlu0 %1551  ;;  %v1727_v5 = vadd.f32 %v1726_v46, %v1724_v45  ;;  %v1686_v56 = vadd.f32 %v1685_v34, %v1684_v15  ;;  %v1645_v38 = vadd.f32 %v1644_v54, %v1643_v9  ;;  %v1391_v10 = vadd.f32 %v1390_v8, %v1348_v59 }
 0x21e   :  { %v1473_v58 = vadd.f32 %v1472_v43, %v1471_v23  ;;  %v1514_v12 = vadd.f32 %v1513_v11, %v1512_v2  ;;  %v1555_v21 = vadd.f32 %v1554_v55, %v1552_v7  ;;  %v1432_v20 = vadd.f32 %v1431_v61, %v1430_v31 }
 0x21f   :  { %v1728_v26 = vrot.slane %v1727_v5, 4  ;;  %v1687_v40 = vrot.slane %v1686_v56, 2  ;;  %v1646_v57 = vrot.slane %v1645_v38, 1  ;;  %v1604_v2 = vadd.f32 %v1603_v28, %v1602_v25 }
 0x220   :  { %v1474_v60 = vrot.slane %v1473_v58, 1  ;;  %v1515_v4 = vrot.slane %v1514_v12, 2  ;;  %v1556_v42 = vrot.slane %v1555_v21, 4  ;;  %v917_v16 = vpop.xlane.xlu1 %916  ;;  %v1433_v22 = vsel %vm567_vm3, %v1432_v20, 0.0 }
 0x221   :  { %v913_v53 = vpop.xlane.xlu0 %912  ;;  %v1729_v50 = vadd.f32 %v1728_v26, %v1727_v5  ;;  %v1688_v29 = vadd.f32 %v1687_v40, %v1686_v56  ;;  %v1434_v62 = vadd.f32 %v1433_v22, %v1391_v10  ;;  %v1647_v11 = vadd.f32 %v1646_v57, %v1645_v38 }
 0x222   :  { %v1516_v44 = vadd.f32 %v1515_v4, %v1514_v12  ;;  %v919_v18 = vadd.f32 %v3414_v52, %v913_v53  ;;  %v1475_v35 = vadd.f32 %v1474_v60, %v1473_v58  ;;  %v1557_v37 = vadd.f32 %v1556_v42, %v1555_v21 }
 0x223   :  { %v1730_v32 = vrot.slane %v1729_v50, 2  ;;  %v1689_v51 = vrot.slane %v1688_v29, 1  ;;  %v1605_v1 = vsel %vm747_vm7, %v1604_v2, 0.0  ;;  %v1648_v56 = vsel %vm792_vm8, %v1647_v11, 0.0 }
 0x224   :  { %v1517_v33 = vrot.slane %v1516_v44, 1  ;;  %v920_v27 = vadd.f32 %v919_v18, %v917_v16  ;;  %v1558_v24 = vrot.slane %v1557_v37, 2  ;;  %v1476_v41 = vsel %vm612_vm4, %v1475_v35, 0.0 }
 0x225   :  { %v1763_v52 = vpop.xlane.xlu0 %1762  ;;  %v1731_v13 = vadd.f32 %v1730_v32, %v1729_v50  ;;  %v1477_v6 = vadd.f32 %v1476_v41, %v1434_v62  ;;  %v1690_v58 = vadd.f32 %v1689_v51, %v1688_v29 }
 0x226   :  { %v1518_v17 = vadd.f32 %v1517_v33, %v1516_v44  ;;  %v921_v3 = vrot.slane %v920_v27, 4  ;;  %v1559_v14 = vadd.f32 %v1558_v24, %v1557_v37  ;;  %v1769_v0 = vadd.f32 %v1768_v30, %v1763_v52 }
 0x227   :  { %v1732_v45 = vrot.slane %v1731_v13, 1  ;;  %v1691_v20 = vsel %vm837_vm9, %v1690_v58, 0.0 }
 0x228   :  { %v922_v63 = vadd.f32 %v921_v3, %v920_v27  ;;  %v1519_v15 = vsel %vm657_vm5, %v1518_v17, 0.0  ;;  %v1560_v48 = vrot.slane %v1559_v14, 1 }
 0x229   :  { %v1767_v31 = vpop.xlane.xlu0 %1766  ;;  %v1520_v34 = vadd.f32 %v1519_v15, %v1477_v6  ;;  %v1733_v21 = vadd.f32 %v1732_v45, %v1731_v13 }
 0x22a   :  { %v923_v36 = vrot.slane %v922_v63, 2  ;;  %v1770_v23 = vadd.f32 %v1769_v0, %v1767_v31  ;;  %v1561_v19 = vadd.f32 %v1560_v48, %v1559_v14 }
 0x22b   :  { %v1734_v25 = vsel %vm882_vm10, %v1733_v21, 0.0 }
 0x22c   :  { %v924_v46 = vadd.f32 %v923_v36, %v922_v63  ;;  %v1771_v43 = vrot.slane %v1770_v23, 4  ;;  %v1562_v55 = vsel %vm702_vm6, %v1561_v19, 0.0 }
 0x22d   :  { %v1563_v61 = vadd.f32 %v1562_v55, %v1520_v34 }
 0x22e   :  { %v925_v9 = vrot.slane %v924_v46, 1  ;;  %v1772_v7 = vadd.f32 %v1771_v43, %v1770_v23 }
 0x22f   :  { %v1606_v12 = vadd.f32 %v1605_v1, %v1563_v61 }
 0x230   :  { %v1773_v5 = vrot.slane %v1772_v7, 2  ;;  %v926_v49 = vadd.f32 %v925_v9, %v924_v46 }
 0x231   :  { %v1649_v26 = vadd.f32 %v1648_v56, %v1606_v12 }
 0x232   :  { %v1774_v60 = vadd.f32 %v1773_v5, %v1772_v7  ;;  %v928_v4 = vsel %vm927_vm11, %v926_v49, 0.0 }
 0x233   :  { %v929_v54 = vadd.f32 %v928_v4, %v3460_v47  ;;  %v1692_v53 = vadd.f32 %v1691_v20, %v1649_v26 }
 0x234   :  { %v1775_v42 = vrot.slane %v1774_v60, 1 }
 0x235   :  { %931 = vst.msk [vmem:[#allocation2] sm:$0x1] %vm930_vm12, %v929_v54  ;;  %v1735_v50 = vadd.f32 %v1734_v25, %v1692_v53 }
 0x236   :  { %v1776_v44 = vadd.f32 %v1775_v42, %v1774_v60 }
 0x238   :  { %v1777_v18 = vsel %vm927_vm11, %v1776_v44, 0.0 }
 0x239   :  { %v1778_v59 = vadd.f32 %v1777_v18, %v1735_v50 }
 0x23b   :  { %1779 = vst.msk [vmem:[#allocation2 + $0x1] sm:$0x1] %vm930_vm12, %v1778_v59 }
 0x23c   :  { %2046 = shalt.err (!%p2043_p4)
}
 0x23d   :  { %s2047_s20 = scalar_lea.hbm %s3516_s5, 32 }
 0x23e   :  { %p2048_p5 = scmp.ne.s32.totalorder %s3516_s5, %s2047_s20  ;;  %p2051_p6 = scmp.lt.u32.totalorder %s2047_s20, %s3516_s5 }
 0x240   :  { %p2053_p7 = pnand %p2051_p6, %p2048_p5 }
 0x242   :  { %2056 = shalt.err (!%p2053_p7)
}
 0x243   :  { %1789 = dma.vmem_to_hbm [thread:$0]  %s1787_s16, 32, %s3516_s5, [#allocation3]  }
 0x244   :  { %2057 = dma.done.wait [#allocation3], 32  }
 0x245   :  { %2058 = vsyncadd [#allocation3], 4294967264 }
 0x246   :  { %1793 = vsyncpa [#allocation3], 1 }

</bundles_post_ra>
